<compile_context>
chip_gen: v7x
topology: tpu7x:2x2x1
jax: 0.10.0
libtpu: 0.0.40
codegen_flags: <defaults>
</compile_context>

<pallas_src>
import math

import jax
import jax.numpy as jnp
from jax.experimental import pallas as pl
from jax.experimental.pallas import tpu as pltpu

LANE = 128          # lane width: all feature dims padded to this
BN_EPS = 1e-5       # PyTorch BatchNorm1d default eps
TB = 256            # batch tile (rows per grid step); multiple of 8/16 sublanes


# ----------------------------- fused VAE kernel -----------------------------
def _make_vae_kernel(n_enc, n_dec):
    """Kernel for a VAE with n_enc encoder blocks and n_dec decoder blocks."""

    def kernel(x_ref, eps_ref,
               enc_w_ref, enc_b_ref, enc_hw_ref, enc_hb_ref,
               dec_w_ref, dec_b_ref, dec_hw_ref, dec_hb_ref,
               enc_out_ref, dec_out_ref):
        # ---- encoder: (Linear + folded eval-BN + Tanh) per block ----
        h = x_ref[...]                                        # (TB, 128) f32
        for l in range(n_enc):                                # unrolled
            h = jnp.tanh(
                jnp.dot(h.astype(jnp.bfloat16), enc_w_ref[l],
                        preferred_element_type=jnp.float32)
                + enc_b_ref[l])

        # ---- fused enc_mu / enc_logvar head: one (128, 256) matmul ----
        head = (jnp.dot(h.astype(jnp.bfloat16), enc_hw_ref[...],
                        preferred_element_type=jnp.float32)
                + enc_hb_ref[...])                            # (TB, 256) f32
        mu = head[:, :LANE]
        logvar = head[:, LANE:]

        # ---- reparameterize: z = mu + eps * exp(0.5 * logvar) (f32) ----
        z = mu + eps_ref[...] * jnp.exp(0.5 * logvar)

        # single lane-dense enc slab: [mu | logvar | z]
        enc_out_ref[:, :2 * LANE] = head
        enc_out_ref[:, 2 * LANE:] = z

        # ---- decoder: (Linear + folded eval-BN + Tanh) per block ----
        d = z
        for l in range(n_dec):                                # unrolled
            d = jnp.tanh(
                jnp.dot(d.astype(jnp.bfloat16), dec_w_ref[l],
                        preferred_element_type=jnp.float32)
                + dec_b_ref[l])

        # ---- fused dec_mu / dec_logvar head: one lane-dense slab ----
        dec_out_ref[...] = (jnp.dot(d.astype(jnp.bfloat16), dec_hw_ref[...],
                                    preferred_element_type=jnp.float32)
                            + dec_hb_ref[...])

    return kernel


def vae_forward(params, x, eps, tb=TB):
    """Fused VAE forward -> (z, enc_mu, enc_logvar, x_hat, dec_mu, dec_logvar)."""
    B = x.shape[0]
    hiddens = params['hiddens']
    d_in, d_lat = hiddens[0], hiddens[-1]
    kp = params['kernel']
    n_enc = kp['enc_w'].shape[0]
    n_dec = kp['dec_w'].shape[0]

    # batch padded to the tile size, features zero-padded to 128 lanes
    n_tiles = pl.cdiv(B, tb)
    B_pad = n_tiles * tb
    x_pad = jnp.zeros((B_pad, LANE), jnp.float32).at[:B, :d_in].set(
        x.astype(jnp.float32))
    eps_pad = jnp.zeros((B_pad, LANE), jnp.float32).at[:B, :d_lat].set(
        eps.astype(jnp.float32))

    grid_spec = pltpu.PrefetchScalarGridSpec(
        num_scalar_prefetch=0,
        grid=(n_tiles,),
        in_specs=[
            pl.BlockSpec((tb, LANE), lambda i: (i, 0)),               # x tile
            pl.BlockSpec((tb, LANE), lambda i: (i, 0)),               # eps tile
            pl.BlockSpec((n_enc, LANE, LANE), lambda i: (0, 0, 0)),   # enc W stack (resident)
            pl.BlockSpec((n_enc, 1, LANE), lambda i: (0, 0, 0)),      # enc b stack (resident)
            pl.BlockSpec((LANE, 2 * LANE), lambda i: (0, 0)),         # enc head W (resident)
            pl.BlockSpec((1, 2 * LANE), lambda i: (0, 0)),            # enc head b (resident)
            pl.BlockSpec((n_dec, LANE, LANE), lambda i: (0, 0, 0)),   # dec W stack (resident)
            pl.BlockSpec((n_dec, 1, LANE), lambda i: (0, 0, 0)),      # dec b stack (resident)
            pl.BlockSpec((LANE, 2 * LANE), lambda i: (0, 0)),         # dec head W (resident)
            pl.BlockSpec((1, 2 * LANE), lambda i: (0, 0)),            # dec head b (resident)
        ],
        out_specs=[
            pl.BlockSpec((tb, 3 * LANE), lambda i: (i, 0)),           # [mu|logvar|z]
            pl.BlockSpec((tb, 2 * LANE), lambda i: (i, 0)),           # [dec_mu|dec_logvar]
        ],
    )

    enc_slab, dec_slab = pl.pallas_call(
        _make_vae_kernel(n_enc, n_dec),
        grid_spec=grid_spec,
        out_shape=[
            jax.ShapeDtypeStruct((B_pad, 3 * LANE), jnp.float32),
            jax.ShapeDtypeStruct((B_pad, 2 * LANE), jnp.float32),
        ],
        compiler_params=pltpu.CompilerParams(
            dimension_semantics=("parallel",),
            vmem_limit_bytes=32 * 1024 * 1024,
        ),
    )(x_pad, eps_pad,
      kp['enc_w'], kp['enc_b'], kp['enc_head_w'], kp['enc_head_b'],
      kp['dec_w'], kp['dec_b'], kp['dec_head_w'], kp['dec_head_b'])

    enc_mu = enc_slab[:B, :d_lat]
    enc_logvar = enc_slab[:B, LANE:LANE + d_lat]
    z = enc_slab[:B, 2 * LANE:2 * LANE + d_lat]
    dec_mu = dec_slab[:B, :d_in]
    dec_logvar = dec_slab[:B, LANE:LANE + d_in]
    x_hat = dec_mu
    return z, enc_mu, enc_logvar, x_hat, dec_mu, dec_logvar


# ----------------------------- parameter construction -----------------------------
def _linear_init(key, in_dim, out_dim):
    # reset_parameters(): uniform(-1/sqrt(fan_in), 1/sqrt(fan_in)) for 2-D weights;
    # nn.Linear default bias init has the same distribution.
    s = 1.0 / math.sqrt(in_dim)
    kw, kb = jax.random.split(key)
    w = jax.random.uniform(kw, (out_dim, in_dim), jnp.float32, -s, s)
    b = jax.random.uniform(kb, (out_dim,), jnp.float32, -s, s)
    return w, b


def _bn_init(key, dim):
    # Non-trivial eval-mode BN stats/affine so the fold path is actually exercised.
    k1, k2, k3, k4 = jax.random.split(key, 4)
    gamma = 1.0 + 0.1 * jax.random.normal(k1, (dim,), jnp.float32)
    beta = 0.1 * jax.random.normal(k2, (dim,), jnp.float32)
    mean = 0.1 * jax.random.normal(k3, (dim,), jnp.float32)
    var = 1.0 + 0.1 * jnp.abs(jax.random.normal(k4, (dim,), jnp.float32))
    return gamma, beta, mean, var


def _fold_bn(w, b, gamma, beta, mean, var):
    # tanh(BN(x @ w.T + b))  ->  tanh(x @ w_eff_t + b_eff)   (eval-mode BN)
    scale = gamma / jnp.sqrt(var + BN_EPS)          # (out,)
    w_eff_t = w.T * scale[None, :]                  # (in, out)
    b_eff = b * scale + (beta - mean * scale)       # (out,)
    return w_eff_t, b_eff


def _pad_mat_bf16(w_t):
    out = jnp.zeros((LANE, LANE), jnp.float32)
    out = out.at[:w_t.shape[0], :w_t.shape[1]].set(w_t)
    return out.astype(jnp.bfloat16)                 # bf16 matmul operand


def _pad_vec(b):
    out = jnp.zeros((1, LANE), jnp.float32)
    return out.at[0, :b.shape[0]].set(b)            # f32 bias (added post-matmul)


def _pad_head(w_mu, b_mu, w_lv, b_lv):
    # fuse mu / logvar linears into one (128, 256) bf16 weight and (1, 256) f32 bias
    w = jnp.concatenate([_pad_mat_bf16(w_mu.T), _pad_mat_bf16(w_lv.T)], axis=1)
    b = jnp.concatenate([_pad_vec(b_mu), _pad_vec(b_lv)], axis=1)
    return w, b


def make_params(key, hiddens):
    n_enc = len(hiddens) - 2
    # decoder loop: for i in range(len(hiddens))[::-1][:-2]: Linear(h[i] -> h[i-1])
    dec_dims = [(hiddens[i], hiddens[i - 1]) for i in range(len(hiddens) - 1, 1, -1)]
    n_dec = len(dec_dims)

    keys = iter(jax.random.split(key, 2 * (n_enc + n_dec) + 4))

    raw = {'enc_layers': [], 'dec_layers': []}
    for i in range(n_enc):
        w, b = _linear_init(next(keys), hiddens[i], hiddens[i + 1])
        g, be, m, v = _bn_init(next(keys), hiddens[i + 1])
        raw['enc_layers'].append((w, b, g, be, m, v))
    raw['enc_mu_w'], raw['enc_mu_b'] = _linear_init(next(keys), hiddens[-2], hiddens[-1])
    raw['enc_logvar_w'], raw['enc_logvar_b'] = _linear_init(next(keys), hiddens[-2], hiddens[-1])
    for (din, dout) in dec_dims:
        w, b = _linear_init(next(keys), din, dout)
        g, be, m, v = _bn_init(next(keys), dout)
        raw['dec_layers'].append((w, b, g, be, m, v))
    raw['dec_mu_w'], raw['dec_mu_b'] = _linear_init(next(keys), hiddens[1], hiddens[0])
    raw['dec_logvar_w'], raw['dec_logvar_b'] = _linear_init(next(keys), hiddens[1], hiddens[0])

    # kernel-ready: fold BN into the Linear, pre-transpose, pad to 128 lanes,
    # cast weights to bf16, and stack per-layer params into single arrays.
    enc_w, enc_b, dec_w, dec_b = [], [], [], []
    for (w, b, g, be, m, v) in raw['enc_layers']:
        wt, bf = _fold_bn(w, b, g, be, m, v)
        enc_w.append(_pad_mat_bf16(wt))
        enc_b.append(_pad_vec(bf))
    for (w, b, g, be, m, v) in raw['dec_layers']:
        wt, bf = _fold_bn(w, b, g, be, m, v)
        dec_w.append(_pad_mat_bf16(wt))
        dec_b.append(_pad_vec(bf))

    kp = {
        'enc_w': jnp.stack(enc_w, axis=0),           # (n_enc, 128, 128) bf16
        'enc_b': jnp.stack(enc_b, axis=0),           # (n_enc, 1, 128) f32
        'dec_w': jnp.stack(dec_w, axis=0),           # (n_dec, 128, 128) bf16
        'dec_b': jnp.stack(dec_b, axis=0),           # (n_dec, 1, 128) f32
    }
    kp['enc_head_w'], kp['enc_head_b'] = _pad_head(
        raw['enc_mu_w'], raw['enc_mu_b'], raw['enc_logvar_w'], raw['enc_logvar_b'])
    kp['dec_head_w'], kp['dec_head_b'] = _pad_head(
        raw['dec_mu_w'], raw['dec_mu_b'], raw['dec_logvar_w'], raw['dec_logvar_b'])

    return {'hiddens': tuple(hiddens), 'raw': raw, 'kernel': kp}


# ----------------------------- pure-JAX references -----------------------------
def vae_reference(params, x, eps):
    """Unfolded f32 eval-mode reference (BN applied explicitly)."""
    raw = params['raw']
    h = x
    for (w, b, g, be, m, v) in raw['enc_layers']:
        h = jnp.tanh(((h @ w.T + b) - m) / jnp.sqrt(v + BN_EPS) * g + be)
    mu = h @ raw['enc_mu_w'].T + raw['enc_mu_b']
    logvar = h @ raw['enc_logvar_w'].T + raw['enc_logvar_b']
    z = mu + eps * jnp.exp(0.5 * logvar)
    d = z
    for (w, b, g, be, m, v) in raw['dec_layers']:
        d = jnp.tanh(((d @ w.T + b) - m) / jnp.sqrt(v + BN_EPS) * g + be)
    dec_mu = d @ raw['dec_mu_w'].T + raw['dec_mu_b']
    dec_logvar = d @ raw['dec_logvar_w'].T + raw['dec_logvar_b']
    return z, mu, logvar, dec_mu, dec_mu, dec_logvar


def vae_reference_folded(params, x, eps):
    """Mirror of the kernel math (folded BN, bf16 padded weights) in plain JAX."""
    kp = params['kernel']
    hiddens = params['hiddens']
    d_in, d_lat = hiddens[0], hiddens[-1]
    B = x.shape[0]
    h = jnp.zeros((B, LANE), jnp.float32).at[:, :d_in].set(x)
    e = jnp.zeros((B, LANE), jnp.float32).at[:, :d_lat].set(eps)
    for l in range(kp['enc_w'].shape[0]):
        h = jnp.tanh(jnp.dot(h.astype(jnp.bfloat16), kp['enc_w'][l],
                             preferred_element_type=jnp.float32) + kp['enc_b'][l])
    head = jnp.dot(h.astype(jnp.bfloat16), kp['enc_head_w'],
                   preferred_element_type=jnp.float32) + kp['enc_head_b']
    mu, logvar = head[:, :LANE], head[:, LANE:]
    z = mu + e * jnp.exp(0.5 * logvar)
    d = z
    for l in range(kp['dec_w'].shape[0]):
        d = jnp.tanh(jnp.dot(d.astype(jnp.bfloat16), kp['dec_w'][l],
                             preferred_element_type=jnp.float32) + kp['dec_b'][l])
    dh = jnp.dot(d.astype(jnp.bfloat16), kp['dec_head_w'],
                 preferred_element_type=jnp.float32) + kp['dec_head_b']
    return (z[:, :d_lat], mu[:, :d_lat], logvar[:, :d_lat],
            dh[:, :d_in], dh[:, :d_in], dh[:, LANE:LANE + d_in])


# ----------------------------- demo / smoke test -----------------------------
if __name__ == "__main__":
    # shapes consistent with the module: args.vae_hiddens = [20, 64, 32, 16]
    # -> enc: 20->64->32, latent 16, dec: 16->32->64, output 20.
    hiddens = [20, 64, 32, 16]
    B = 2

    key = jax.random.PRNGKey(0)
    kp_, kx_, ke_, kx2_, ke2_ = jax.random.split(key, 5)

    params = make_params(kp_, hiddens)
    x = jax.random.normal(kx_, (B, hiddens[0]), jnp.float32)
    eps = jax.random.normal(ke_, (B, hiddens[-1]), jnp.float32)

    outs = vae_forward(params, x, eps)
    outs = jax.block_until_ready(outs)
    z, enc_mu, enc_logvar, x_hat, dec_mu, dec_logvar = outs

    assert z.shape == (B, hiddens[-1])
    assert enc_mu.shape == (B, hiddens[-1])
    assert enc_logvar.shape == (B, hiddens[-1])
    assert x_hat.shape == (B, hiddens[0])
    assert dec_mu.shape == (B, hiddens[0])
    assert dec_logvar.shape == (B, hiddens[0])

    # reparameterization identity (exact self-consistency with kernel outputs)
    assert jnp.allclose(z, enc_mu + eps * jnp.exp(0.5 * enc_logvar), atol=1e-4)

    # cross-check against the f32 unfolded reference (loose: bf16 weights + MXU)
    refs = vae_reference(params, x, eps)
    for got, ref in zip(outs, refs):
        assert jnp.max(jnp.abs(got - ref)) < 1e-1

    # tight cross-check against a plain-JAX mirror of the folded/bf16 kernel math
    refs_f = vae_reference_folded(params, x, eps)
    for got, ref in zip(outs, refs_f):
        assert jnp.max(jnp.abs(got - ref)) < 5e-3

    # larger batch to exercise multiple grid steps (pipelined batch tiling)
    B2 = 512
    x2 = jax.random.normal(kx2_, (B2, hiddens[0]), jnp.float32)
    eps2 = jax.random.normal(ke2_, (B2, hiddens[-1]), jnp.float32)
    outs2 = jax.block_until_ready(vae_forward(params, x2, eps2))
    refs2 = vae_reference(params, x2, eps2)
    for got, ref in zip(outs2, refs2):
        assert jnp.max(jnp.abs(got - ref)) < 1e-1

    print("KERNEL_OK")
</pallas_src>

<mosaic_0001>
module attributes {stable_mosaic.version = 11 : i64} {
  func.func @kernel(%arg0: i32, %arg1: memref<256x128xf32, #tpu.memory_space<vmem>>, %arg2: memref<256x128xf32, #tpu.memory_space<vmem>>, %arg3: memref<2x128x128xbf16, #tpu.memory_space<vmem>>, %arg4: memref<2x1x128xf32, #tpu.memory_space<vmem>>, %arg5: memref<128x256xbf16, #tpu.memory_space<vmem>>, %arg6: memref<1x256xf32, #tpu.memory_space<vmem>>, %arg7: memref<2x128x128xbf16, #tpu.memory_space<vmem>>, %arg8: memref<2x1x128xf32, #tpu.memory_space<vmem>>, %arg9: memref<128x256xbf16, #tpu.memory_space<vmem>>, %arg10: memref<1x256xf32, #tpu.memory_space<vmem>>, %arg11: memref<256x384xf32, #tpu.memory_space<vmem>>, %arg12: memref<256x256xf32, #tpu.memory_space<vmem>>) attributes {dimension_semantics = [#tpu.dimension_semantics<parallel>], iteration_bounds = array<i64: 1>, scalar_prefetch = 0 : i64, scratch_operands = 0 : i64, tpu.core_type = #tpu.core_type<tc>, window_params = [{transform_indices = @transform_0, window_bounds = array<i64: 256, 128>}, {transform_indices = @transform_1, window_bounds = array<i64: 256, 128>}, {pipeline_mode = #tpu.pipeline_mode<synchronous>, transform_indices = @transform_2, window_bounds = array<i64: 2, 128, 128>}, {pipeline_mode = #tpu.pipeline_mode<synchronous>, transform_indices = @transform_3, window_bounds = array<i64: 2, 1, 128>}, {pipeline_mode = #tpu.pipeline_mode<synchronous>, transform_indices = @transform_4, window_bounds = array<i64: 128, 256>}, {pipeline_mode = #tpu.pipeline_mode<synchronous>, transform_indices = @transform_5, window_bounds = array<i64: 1, 256>}, {pipeline_mode = #tpu.pipeline_mode<synchronous>, transform_indices = @transform_6, window_bounds = array<i64: 2, 128, 128>}, {pipeline_mode = #tpu.pipeline_mode<synchronous>, transform_indices = @transform_7, window_bounds = array<i64: 2, 1, 128>}, {pipeline_mode = #tpu.pipeline_mode<synchronous>, transform_indices = @transform_8, window_bounds = array<i64: 128, 256>}, {pipeline_mode = #tpu.pipeline_mode<synchronous>, transform_indices = @transform_9, window_bounds = array<i64: 1, 256>}, {transform_indices = @transform_10, window_bounds = array<i64: 256, 384>}, {transform_indices = @transform_11, window_bounds = array<i64: 256, 256>}]} {
    %c0 = arith.constant 0 : index
    %c0_0 = arith.constant 0 : index
    %0 = vector.load %arg1[%c0, %c0_0] : memref<256x128xf32, #tpu.memory_space<vmem>>, vector<256x128xf32>
    %1 = arith.truncf %0 : vector<256x128xf32> to vector<256x128xbf16>
    %c0_1 = arith.constant 0 : index
    %c0_2 = arith.constant 0 : index
    %c0_3 = arith.constant 0 : index
    %2 = vector.load %arg3[%c0_1, %c0_2, %c0_3] : memref<2x128x128xbf16, #tpu.memory_space<vmem>>, vector<1x128x128xbf16>
    %3 = vector.shape_cast %2 : vector<1x128x128xbf16> to vector<128x128xbf16>
    %cst = arith.constant dense<0.000000e+00> : vector<256x128xf32>
    %4 = tpu.matmul %1, %3, %cst {dimension_numbers = #tpu.dot_dimension_numbers<[1], [0], [0], [1], [0, 0, 1, 1], [], []>} : vector<256x128xbf16>, vector<128x128xbf16>, vector<256x128xf32> -> vector<256x128xf32>
    %c0_4 = arith.constant 0 : index
    %c0_5 = arith.constant 0 : index
    %c0_6 = arith.constant 0 : index
    %5 = vector.load %arg4[%c0_4, %c0_5, %c0_6] : memref<2x1x128xf32, #tpu.memory_space<vmem>>, vector<1x1x128xf32>
    %6 = vector.shape_cast %5 : vector<1x1x128xf32> to vector<1x128xf32>
    %7 = vector.broadcast %6 : vector<1x128xf32> to vector<256x128xf32>
    %8 = arith.addf %4, %7 : vector<256x128xf32>
    %9 = math.tanh %8 : vector<256x128xf32>
    %10 = arith.truncf %9 : vector<256x128xf32> to vector<256x128xbf16>
    %c1 = arith.constant 1 : index
    %c0_7 = arith.constant 0 : index
    %c0_8 = arith.constant 0 : index
    %11 = vector.load %arg3[%c1, %c0_7, %c0_8] : memref<2x128x128xbf16, #tpu.memory_space<vmem>>, vector<1x128x128xbf16>
    %12 = vector.shape_cast %11 : vector<1x128x128xbf16> to vector<128x128xbf16>
    %cst_9 = arith.constant dense<0.000000e+00> : vector<256x128xf32>
    %13 = tpu.matmul %10, %12, %cst_9 {dimension_numbers = #tpu.dot_dimension_numbers<[1], [0], [0], [1], [0, 0, 1, 1], [], []>} : vector<256x128xbf16>, vector<128x128xbf16>, vector<256x128xf32> -> vector<256x128xf32>
    %c1_10 = arith.constant 1 : index
    %c0_11 = arith.constant 0 : index
    %c0_12 = arith.constant 0 : index
    %14 = vector.load %arg4[%c1_10, %c0_11, %c0_12] : memref<2x1x128xf32, #tpu.memory_space<vmem>>, vector<1x1x128xf32>
    %15 = vector.shape_cast %14 : vector<1x1x128xf32> to vector<1x128xf32>
    %16 = vector.broadcast %15 : vector<1x128xf32> to vector<256x128xf32>
    %17 = arith.addf %13, %16 : vector<256x128xf32>
    %18 = math.tanh %17 : vector<256x128xf32>
    %19 = arith.truncf %18 : vector<256x128xf32> to vector<256x128xbf16>
    %c0_13 = arith.constant 0 : index
    %c0_14 = arith.constant 0 : index
    %20 = vector.load %arg5[%c0_13, %c0_14] : memref<128x256xbf16, #tpu.memory_space<vmem>>, vector<128x256xbf16>
    %cst_15 = arith.constant dense<0.000000e+00> : vector<256x256xf32>
    %21 = tpu.matmul %19, %20, %cst_15 {dimension_numbers = #tpu.dot_dimension_numbers<[1], [0], [0], [1], [0, 0, 1, 1], [], []>} : vector<256x128xbf16>, vector<128x256xbf16>, vector<256x256xf32> -> vector<256x256xf32>
    %c0_16 = arith.constant 0 : index
    %c0_17 = arith.constant 0 : index
    %22 = vector.load %arg6[%c0_16, %c0_17] : memref<1x256xf32, #tpu.memory_space<vmem>>, vector<1x256xf32>
    %23 = vector.broadcast %22 : vector<1x256xf32> to vector<256x256xf32>
    %24 = arith.addf %21, %23 : vector<256x256xf32>
    %25 = vector.extract_strided_slice %24 {offsets = [0, 0], sizes = [256, 128], strides = [1, 1]} : vector<256x256xf32> to vector<256x128xf32>
    %26 = vector.extract_strided_slice %24 {offsets = [0, 128], sizes = [256, 128], strides = [1, 1]} : vector<256x256xf32> to vector<256x128xf32>
    %c0_18 = arith.constant 0 : index
    %c0_19 = arith.constant 0 : index
    %27 = vector.load %arg2[%c0_18, %c0_19] : memref<256x128xf32, #tpu.memory_space<vmem>>, vector<256x128xf32>
    %cst_20 = arith.constant 5.000000e-01 : f32
    %28 = vector.broadcast %cst_20 : f32 to vector<256x128xf32>
    %29 = arith.mulf %28, %26 : vector<256x128xf32>
    %30 = math.exp %29 : vector<256x128xf32>
    %31 = arith.mulf %27, %30 : vector<256x128xf32>
    %32 = arith.addf %25, %31 : vector<256x128xf32>
    %c0_21 = arith.constant 0 : index
    %c0_22 = arith.constant 0 : index
    %33 = vector.load %arg11[%c0_21, %c0_22] : memref<256x384xf32, #tpu.memory_space<vmem>>, vector<256x256xf32>
    tpu.vector_store %arg11[%c0_21, %c0_22], %24 {strides = array<i32>} : memref<256x384xf32, #tpu.memory_space<vmem>>, vector<256x256xf32>,
    %c0_23 = arith.constant 0 : index
    %c256 = arith.constant 256 : index
    %34 = vector.load %arg11[%c0_23, %c256] : memref<256x384xf32, #tpu.memory_space<vmem>>, vector<256x128xf32>
    tpu.vector_store %arg11[%c0_23, %c256], %32 {strides = array<i32>} : memref<256x384xf32, #tpu.memory_space<vmem>>, vector<256x128xf32>,
    %35 = arith.truncf %32 : vector<256x128xf32> to vector<256x128xbf16>
    %c0_24 = arith.constant 0 : index
    %c0_25 = arith.constant 0 : index
    %c0_26 = arith.constant 0 : index
    %36 = vector.load %arg7[%c0_24, %c0_25, %c0_26] : memref<2x128x128xbf16, #tpu.memory_space<vmem>>, vector<1x128x128xbf16>
    %37 = vector.shape_cast %36 : vector<1x128x128xbf16> to vector<128x128xbf16>
    %cst_27 = arith.constant dense<0.000000e+00> : vector<256x128xf32>
    %38 = tpu.matmul %35, %37, %cst_27 {dimension_numbers = #tpu.dot_dimension_numbers<[1], [0], [0], [1], [0, 0, 1, 1], [], []>} : vector<256x128xbf16>, vector<128x128xbf16>, vector<256x128xf32> -> vector<256x128xf32>
    %c0_28 = arith.constant 0 : index
    %c0_29 = arith.constant 0 : index
    %c0_30 = arith.constant 0 : index
    %39 = vector.load %arg8[%c0_28, %c0_29, %c0_30] : memref<2x1x128xf32, #tpu.memory_space<vmem>>, vector<1x1x128xf32>
    %40 = vector.shape_cast %39 : vector<1x1x128xf32> to vector<1x128xf32>
    %41 = vector.broadcast %40 : vector<1x128xf32> to vector<256x128xf32>
    %42 = arith.addf %38, %41 : vector<256x128xf32>
    %43 = math.tanh %42 : vector<256x128xf32>
    %44 = arith.truncf %43 : vector<256x128xf32> to vector<256x128xbf16>
    %c1_31 = arith.constant 1 : index
    %c0_32 = arith.constant 0 : index
    %c0_33 = arith.constant 0 : index
    %45 = vector.load %arg7[%c1_31, %c0_32, %c0_33] : memref<2x128x128xbf16, #tpu.memory_space<vmem>>, vector<1x128x128xbf16>
    %46 = vector.shape_cast %45 : vector<1x128x128xbf16> to vector<128x128xbf16>
    %cst_34 = arith.constant dense<0.000000e+00> : vector<256x128xf32>
    %47 = tpu.matmul %44, %46, %cst_34 {dimension_numbers = #tpu.dot_dimension_numbers<[1], [0], [0], [1], [0, 0, 1, 1], [], []>} : vector<256x128xbf16>, vector<128x128xbf16>, vector<256x128xf32> -> vector<256x128xf32>
    %c1_35 = arith.constant 1 : index
    %c0_36 = arith.constant 0 : index
    %c0_37 = arith.constant 0 : index
    %48 = vector.load %arg8[%c1_35, %c0_36, %c0_37] : memref<2x1x128xf32, #tpu.memory_space<vmem>>, vector<1x1x128xf32>
    %49 = vector.shape_cast %48 : vector<1x1x128xf32> to vector<1x128xf32>
    %50 = vector.broadcast %49 : vector<1x128xf32> to vector<256x128xf32>
    %51 = arith.addf %47, %50 : vector<256x128xf32>
    %52 = math.tanh %51 : vector<256x128xf32>
    %53 = arith.truncf %52 : vector<256x128xf32> to vector<256x128xbf16>
    %c0_38 = arith.constant 0 : index
    %c0_39 = arith.constant 0 : index
    %54 = vector.load %arg9[%c0_38, %c0_39] : memref<128x256xbf16, #tpu.memory_space<vmem>>, vector<128x256xbf16>
    %cst_40 = arith.constant dense<0.000000e+00> : vector<256x256xf32>
    %55 = tpu.matmul %53, %54, %cst_40 {dimension_numbers = #tpu.dot_dimension_numbers<[1], [0], [0], [1], [0, 0, 1, 1], [], []>} : vector<256x128xbf16>, vector<128x256xbf16>, vector<256x256xf32> -> vector<256x256xf32>
    %c0_41 = arith.constant 0 : index
    %c0_42 = arith.constant 0 : index
    %56 = vector.load %arg10[%c0_41, %c0_42] : memref<1x256xf32, #tpu.memory_space<vmem>>, vector<1x256xf32>
    %57 = vector.broadcast %56 : vector<1x256xf32> to vector<256x256xf32>
    %58 = arith.addf %55, %57 : vector<256x256xf32>
    %c0_43 = arith.constant 0 : index
    %c0_44 = arith.constant 0 : index
    %59 = vector.load %arg12[%c0_43, %c0_44] : memref<256x256xf32, #tpu.memory_space<vmem>>, vector<256x256xf32>
    tpu.vector_store %arg12[%c0_43, %c0_44], %58 {strides = array<i32>} : memref<256x256xf32, #tpu.memory_space<vmem>>, vector<256x256xf32>,
    return
  }
  func.func @transform_0(%arg0: i32) -> (i32, i32) {
    %c0_i32 = arith.constant 0 : i32
    %c0_i32_0 = arith.constant 0 : i32
    return %arg0, %c0_i32 : i32, i32
  }
  func.func @transform_1(%arg0: i32) -> (i32, i32) {
    %c0_i32 = arith.constant 0 : i32
    %c0_i32_0 = arith.constant 0 : i32
    return %arg0, %c0_i32 : i32, i32
  }
  func.func @transform_2(%arg0: i32) -> (i32, i32, i32) {
    %c0_i32 = arith.constant 0 : i32
    %c0_i32_0 = arith.constant 0 : i32
    %c0_i32_1 = arith.constant 0 : i32
    %c0_i32_2 = arith.constant 0 : i32
    return %c0_i32, %c0_i32_0, %c0_i32_1 : i32, i32, i32
  }
  func.func @transform_3(%arg0: i32) -> (i32, i32, i32) {
    %c0_i32 = arith.constant 0 : i32
    %c0_i32_0 = arith.constant 0 : i32
    %c0_i32_1 = arith.constant 0 : i32
    %c0_i32_2 = arith.constant 0 : i32
    return %c0_i32, %c0_i32_0, %c0_i32_1 : i32, i32, i32
  }
  func.func @transform_4(%arg0: i32) -> (i32, i32) {
    %c0_i32 = arith.constant 0 : i32
    %c0_i32_0 = arith.constant 0 : i32
    %c0_i32_1 = arith.constant 0 : i32
    return %c0_i32, %c0_i32_0 : i32, i32
  }
  func.func @transform_5(%arg0: i32) -> (i32, i32) {
    %c0_i32 = arith.constant 0 : i32
    %c0_i32_0 = arith.constant 0 : i32
    %c0_i32_1 = arith.constant 0 : i32
    return %c0_i32, %c0_i32_0 : i32, i32
  }
  func.func @transform_6(%arg0: i32) -> (i32, i32, i32) {
    %c0_i32 = arith.constant 0 : i32
    %c0_i32_0 = arith.constant 0 : i32
    %c0_i32_1 = arith.constant 0 : i32
    %c0_i32_2 = arith.constant 0 : i32
    return %c0_i32, %c0_i32_0, %c0_i32_1 : i32, i32, i32
  }
  func.func @transform_7(%arg0: i32) -> (i32, i32, i32) {
    %c0_i32 = arith.constant 0 : i32
    %c0_i32_0 = arith.constant 0 : i32
    %c0_i32_1 = arith.constant 0 : i32
    %c0_i32_2 = arith.constant 0 : i32
    return %c0_i32, %c0_i32_0, %c0_i32_1 : i32, i32, i32
  }
  func.func @transform_8(%arg0: i32) -> (i32, i32) {
    %c0_i32 = arith.constant 0 : i32
    %c0_i32_0 = arith.constant 0 : i32
    %c0_i32_1 = arith.constant 0 : i32
    return %c0_i32, %c0_i32_0 : i32, i32
  }
  func.func @transform_9(%arg0: i32) -> (i32, i32) {
    %c0_i32 = arith.constant 0 : i32
    %c0_i32_0 = arith.constant 0 : i32
    %c0_i32_1 = arith.constant 0 : i32
    return %c0_i32, %c0_i32_0 : i32, i32
  }
  func.func @transform_10(%arg0: i32) -> (i32, i32) {
    %c0_i32 = arith.constant 0 : i32
    %c0_i32_0 = arith.constant 0 : i32
    return %arg0, %c0_i32 : i32, i32
  }
  func.func @transform_11(%arg0: i32) -> (i32, i32) {
    %c0_i32 = arith.constant 0 : i32
    %c0_i32_0 = arith.constant 0 : i32
    return %arg0, %c0_i32 : i32, i32
  }
}

</mosaic_0001>

<bundles_post_ra>
// kernel: tpu_custom_call.1
= control target key start
LH: loop header
LB: loop body
LE: loop exit
PB: predicated region body
PF: predicated region fallthrough
CT: control target
= control target key end

     0   :  { %17 = vsyncpa [#allocation3], 0  ;;  %s3943_s0 = inlined_call_operand.hbm [shape: f32[256,128], index: 0, kind: input, shape index: {}]   ;;  %s3944_s1 = inlined_call_operand.hbm [shape: f32[256,128], index: 1, kind: input, shape index: {}]   ;;  %s3945_s2 = inlined_call_operand.hbm [shape: bf16[2,128,128], index: 2, kind: input, shape index: {}]   ;;  %s3946_s3 = inlined_call_operand.vmem [shape: f32[2,1,128], index: 3, kind: input, shape index: {}]   ;;  %s3947_s4 = inlined_call_operand.hbm [shape: bf16[128,256], index: 4, kind: input, shape index: {}]   ;;  %s3948_s5 = inlined_call_operand.vmem [shape: f32[1,256], index: 5, kind: input, shape index: {}]   ;;  %s3949_s6 = inlined_call_operand.hbm [shape: bf16[2,128,128], index: 6, kind: input, shape index: {}]   ;;  %s3950_s7 = inlined_call_operand.vmem [shape: f32[2,1,128], index: 7, kind: input, shape index: {}]   ;;  %s3951_s8 = inlined_call_operand.hbm [shape: bf16[128,256], index: 8, kind: input, shape index: {}]   ;;  %s3952_s9 = inlined_call_operand.vmem [shape: f32[1,256], index: 9, kind: input, shape index: {}]   ;;  %s3953_s10 = inlined_call_operand.hbm [shape: f32[256,384], index: 10, kind: output, shape index: {0}]   ;;  %s3954_s11 = inlined_call_operand.hbm [shape: f32[256,256], index: 11, kind: output, shape index: {1}]  }
   0x1   :  { %18 = vsyncpa [#allocation6], 0 }
   0x2   :  { %19 = vsyncpa [#allocation9], 0 }
   0x3   :  { %20 = vsyncpa [#allocation12], 0 }
   0x4   :  { %21 = vsyncpa [#allocation4], 0 }
   0x5   :  { %22 = vsyncpa [#allocation15], 0  ;;  %s3263_s17 = smov [#allocation5]   ;;  %s3264_s19 = smov [#allocation8]  }
   0x6   :  { %s40_s18 = sshll.u32 %s3263_s17, 4  ;;  %s66_s20 = sshll.u32 %s3264_s19, 4  ;;  %s41_s18 = int_to_ptr.vmem [resolvable:$true] %s40_s18  ;;  %s3340_s20 = int_to_ptr.vmem [resolvable:$true] %s66_s20 }
   0x7   :  { %s3075_s23 = scalar_lea.hbm %s3944_s1, 4096 }
   0x8   :  { %p3076_p0 = scmp.ne.s32.totalorder %s3944_s1, %s3075_s23  ;;  %p3079_p1 = scmp.lt.u32.totalorder %s3075_s23, %s3944_s1 }
   0xa   :  { %p3081_p2 = pnand %p3079_p1, %p3076_p0 }
   0xc   :  { %3084 = shalt.err (!%p3081_p2)
}
   0xd   :  { %s3085_s28 = scalar_lea.vmem %s41_s18, 4096  ;;  %p3090_p4 = scmp.lt.s32.totalorder %s41_s18, %s41_s18 }
   0xe   :  { %p3086_p3 = scmp.ne.s32.totalorder %s41_s18, %s3085_s28  ;;  %p3091_p5 = scmp.lt.s32.totalorder %s3085_s28, %s3085_s28 }
  0x10   :  { %p3092_p6 = por %p3091_p5, %p3090_p4 }
  0x12   :  { %p3093_p7 = pnand %p3092_p6, %p3086_p3 }
  0x14   :  { %3096 = shalt.err (!%p3093_p7)
}
  0x15   :  { %s3265_s29 = smov 128   ;;  %s3266_s30 = smov 8  }
  0x16   :  { %46 = dma.hbm_to_vmem [thread:$0]  %s3944_s1, 4096, %s41_s18, [#allocation6], %s3265_s29, %s3265_s29, %s3266_s30  }
  0x17   :  { %s3097_s16 = scalar_lea.hbm %s3947_s4, 2048 }
  0x18   :  { %p3098_p8 = scmp.ne.s32.totalorder %s3947_s4, %s3097_s16  ;;  %p3101_p9 = scmp.lt.u32.totalorder %s3097_s16, %s3947_s4 }
  0x1a   :  { %p3103_p10 = pnand %p3101_p9, %p3098_p8 }
  0x1c   :  { %3106 = shalt.err (!%p3103_p10)
}
  0x1d   :  { %s3107_s23 = scalar_lea.vmem %s3340_s20, 2048  ;;  %p3112_p12 = scmp.lt.s32.totalorder %s3340_s20, %s3340_s20 }
  0x1e   :  { %p3108_p11 = scmp.ne.s32.totalorder %s3340_s20, %s3107_s23  ;;  %p3113_p13 = scmp.lt.s32.totalorder %s3107_s23, %s3107_s23 }
  0x20   :  { %p3114_p0 = por %p3113_p13, %p3112_p12 }
  0x22   :  { %p3115_p1 = pnand %p3114_p0, %p3108_p11 }
  0x24   :  { %3118 = shalt.err (!%p3115_p1)
}
  0x25   :  { %72 = dma.hbm_to_vmem [thread:$0]  %s3947_s4, 2048, %s3340_s20, [#allocation9], %s3265_s29, %s3265_s29, %s3266_s30  }
  0x26   :  { %s3267_s24 = smov [#allocation2]   ;;  %s3268_s26 = smov [#allocation7]  }
  0x27   :  { %s28_s25 = sshll.u32 %s3267_s24, 4  ;;  %s52_s27 = sshll.u32 %s3268_s26, 4  ;;  %s29_s25 = int_to_ptr.vmem [resolvable:$true] %s28_s25  ;;  %s3377_s27 = int_to_ptr.vmem [resolvable:$true] %s52_s27 }
  0x28   :  { %s3119_s13 = scalar_lea.hbm %s3943_s0, 4096 }
  0x29   :  { %p3120_p2 = scmp.ne.s32.totalorder %s3943_s0, %s3119_s13  ;;  %p3123_p3 = scmp.lt.u32.totalorder %s3119_s13, %s3943_s0 }
  0x2b   :  { %p3125_p4 = pnand %p3123_p3, %p3120_p2 }
  0x2d   :  { %3128 = shalt.err (!%p3125_p4)
}
  0x2e   :  { %s3129_s4 = scalar_lea.vmem %s29_s25, 4096  ;;  %p3134_p6 = scmp.lt.s32.totalorder %s29_s25, %s29_s25 }
  0x2f   :  { %p3130_p5 = scmp.ne.s32.totalorder %s29_s25, %s3129_s4  ;;  %p3135_p7 = scmp.lt.s32.totalorder %s3129_s4, %s3129_s4 }
  0x31   :  { %p3136_p8 = por %p3135_p7, %p3134_p6 }
  0x33   :  { %p3137_p9 = pnand %p3136_p8, %p3130_p5 }
  0x35   :  { %3140 = shalt.err (!%p3137_p9)
}
  0x36   :  { %34 = dma.hbm_to_vmem [thread:$0]  %s3943_s0, 4096, %s29_s25, [#allocation3], %s3265_s29, %s3265_s29, %s3266_s30  }
  0x37   :  { %s3141_s23 = scalar_lea.hbm %s3945_s2, 2048 }
  0x38   :  { %p3142_p10 = scmp.ne.s32.totalorder %s3945_s2, %s3141_s23  ;;  %p3145_p11 = scmp.lt.u32.totalorder %s3141_s23, %s3945_s2 }
  0x3a   :  { %p3147_p12 = pnand %p3145_p11, %p3142_p10 }
  0x3c   :  { %3150 = shalt.err (!%p3147_p12)
}
  0x3d   :  { %s3151_s28 = scalar_lea.vmem %s3377_s27, 2048  ;;  %p3156_p0 = scmp.lt.s32.totalorder %s3377_s27, %s3377_s27 }
  0x3e   :  { %p3152_p13 = scmp.ne.s32.totalorder %s3377_s27, %s3151_s28  ;;  %p3157_p1 = scmp.lt.s32.totalorder %s3151_s28, %s3151_s28 }
  0x40   :  { %p3158_p2 = por %p3157_p1, %p3156_p0 }
  0x42   :  { %p3159_p3 = pnand %p3158_p2, %p3152_p13 }
  0x44   :  { %3162 = shalt.err (!%p3159_p3)
}
  0x45   :  { %s3269_s0 = smov 64   ;;  %s3270_s25 = smov 4  }
  0x46   :  { %58 = dma.hbm_to_vmem [thread:$0]  %s3945_s2, 2048, %s3377_s27, [#allocation6], %s3269_s0, %s3269_s0, %s3270_s25  }
  0x47   :  { %s3271_s14 = smov [#allocation10]   ;;  %s3272_s16 = smov [#allocation11]  }
  0x48   :  { %s80_s15 = sshll.u32 %s3271_s14, 4  ;;  %s94_s17 = sshll.u32 %s3272_s16, 4  ;;  %s81_s15 = int_to_ptr.vmem [resolvable:$true] %s80_s15  ;;  %s3411_s17 = int_to_ptr.vmem [resolvable:$true] %s94_s17 }
  0x49   :  { %s3163_s19 = scalar_lea.hbm %s3949_s6, 2048 }
  0x4a   :  { %p3164_p4 = scmp.ne.s32.totalorder %s3949_s6, %s3163_s19  ;;  %p3167_p5 = scmp.lt.u32.totalorder %s3163_s19, %s3949_s6 }
  0x4c   :  { %p3169_p6 = pnand %p3167_p5, %p3164_p4 }
  0x4e   :  { %3172 = shalt.err (!%p3169_p6)
}
  0x4f   :  { %s3173_s2 = scalar_lea.vmem %s81_s15, 2048  ;;  %p3178_p8 = scmp.lt.s32.totalorder %s81_s15, %s81_s15 }
  0x50   :  { %p3174_p7 = scmp.ne.s32.totalorder %s81_s15, %s3173_s2  ;;  %p3179_p9 = scmp.lt.s32.totalorder %s3173_s2, %s3173_s2 }
  0x52   :  { %p3180_p10 = por %p3179_p9, %p3178_p8 }
  0x54   :  { %p3181_p11 = pnand %p3180_p10, %p3174_p7 }
  0x56   :  { %3184 = shalt.err (!%p3181_p11)
}
  0x57   :  { %86 = dma.hbm_to_vmem [thread:$0]  %s3949_s6, 2048, %s81_s15, [#allocation9], %s3269_s0, %s3269_s0, %s3270_s25  }
  0x58   :  { %s3185_s28 = scalar_lea.hbm %s3951_s8, 2048 }
  0x59   :  { %p3186_p12 = scmp.ne.s32.totalorder %s3951_s8, %s3185_s28  ;;  %p3189_p13 = scmp.lt.u32.totalorder %s3185_s28, %s3951_s8 }
  0x5b   :  { %p3191_p0 = pnand %p3189_p13, %p3186_p12 }
  0x5d   :  { %3194 = shalt.err (!%p3191_p0)
}
  0x5e   :  { %s3195_s4 = scalar_lea.vmem %s3411_s17, 2048  ;;  %p3200_p2 = scmp.lt.s32.totalorder %s3411_s17, %s3411_s17 }
  0x5f   :  { %p3196_p1 = scmp.ne.s32.totalorder %s3411_s17, %s3195_s4  ;;  %p3201_p3 = scmp.lt.s32.totalorder %s3195_s4, %s3195_s4 }
  0x61   :  { %p3202_p4 = por %p3201_p3, %p3200_p2 }
  0x63   :  { %p3203_p5 = pnand %p3202_p4, %p3196_p1 }
  0x65   :  { %3206 = shalt.err (!%p3203_p5)
}
  0x66   :  { %100 = dma.hbm_to_vmem [thread:$0]  %s3951_s8, 2048, %s3411_s17, [#allocation12], %s3265_s29, %s3265_s29, %s3266_s30  }
  0x67   :  { %3251 = dma.done.wait [#allocation3], 4096  }
  0x68   :  { %3252 = vsyncadd [#allocation3], 4294963200 }
  0x69   :  { %3253 = dma.done.wait [#allocation6], 6144  }
  0x6a   :  { %3254 = vsyncadd [#allocation6], 4294961152 }
  0x6b   :  { %3255 = dma.done.wait [#allocation9], 4096  }
  0x6c   :  { %3256 = vsyncadd [#allocation9], 4294963200 }
  0x6d   :  { %3257 = dma.done.wait [#allocation12], 2048  }
  0x6e   :  { %3258 = vsyncadd [#allocation12], 4294965248  ;;  %v2675_v0 = vld [vmem:[#allocation7] sm:$0xff]   ;;  %v2676_v1 = vld [vmem:[#allocation7 + $0x8] sm:$0xff]   ;;  %s3274_s22 = smov [#allocation13]  }
  0x6f   :  { %2466 = vmatprep.subr.bf16.mxu1 %v2675_v0  ;;  %v2677_v2 = vld [vmem:[#allocation7 + $0x10] sm:$0xff]   ;;  %v2678_v3 = vld [vmem:[#allocation7 + $0x18] sm:$0xff]   ;;  %v122_v4 = vld [vmem:[#allocation2] sm:$0xff]  ;;  %s2269_s23 = sshll.u32 %s3274_s22, 4  ;;  %s2270_s23 = int_to_ptr.vmem [resolvable:$true] %s2269_s23 }
  0x70   :  { %2467 = vmatpush3.bf16.msra.mxu1 %v2675_v0  ;;  %v123_v5 = vld [vmem:[#allocation2 + $0x8] sm:$0xff]  ;;  %v2679_v7 = vld [vmem:[#allocation7 + $0x20] sm:$0xff]   ;;  %v2681_v9 = vld [vmem:[#allocation7 + $0x30] sm:$0xff]   ;;  %s3207_s1 = scalar_lea.vmem %s2270_s23, 12288  ;;  %p3212_p7 = scmp.lt.s32.totalorder %s2270_s23, %s2270_s23 }
  0x71   :  { %2468 = vmatprep.subr.bf16.mxu1 %v2676_v1  ;;  %v154_v6 = vpack.c.bf16 %v123_v5, %v122_v4  ;;  %v2680_v8 = vld [vmem:[#allocation7 + $0x28] sm:$0xff]   ;;  %v2682_v10 = vld [vmem:[#allocation7 + $0x38] sm:$0xff]   ;;  %v124_v11 = vld [vmem:[#allocation2 + $0x10] sm:$0xff]  ;;  %p3208_p6 = scmp.ne.s32.totalorder %s2270_s23, %s3207_s1  ;;  %p3213_p8 = scmp.lt.s32.totalorder %s3207_s1, %s3207_s1 }
  0x72   :  { %v125_v12 = vld [vmem:[#allocation2 + $0x18] sm:$0xff]  ;;  %v126_v13 = vld [vmem:[#allocation2 + $0x20] sm:$0xff]  ;;  %v127_v14 = vld [vmem:[#allocation2 + $0x28] sm:$0xff] }
  0x73   :  { %2482 = vmatprep.mubr.bf16.mxu1 %v154_v6  ;;  %v2683_v15 = vld [vmem:[#allocation7 + $0x40] sm:$0xff]   ;;  %v155_v16 = vpack.c.bf16 %v125_v12, %v124_v11  ;;  %v2684_v17 = vld [vmem:[#allocation7 + $0x48] sm:$0xff]   ;;  %v156_v18 = vpack.c.bf16 %v127_v14, %v126_v13  ;;  %v128_v19 = vld [vmem:[#allocation2 + $0x30] sm:$0xff]  ;;  %p3214_p9 = por %p3213_p8, %p3212_p7 }
  0x74   :  { %2469 = vmatpush3.bf16.msra.mxu1 %v2676_v1  ;;  %v129_v20 = vld [vmem:[#allocation2 + $0x38] sm:$0xff]  ;;  %v130_v21 = vld [vmem:[#allocation2 + $0x40] sm:$0xff]  ;;  %v131_v22 = vld [vmem:[#allocation2 + $0x48] sm:$0xff] }
  0x75   :  { %2470 = vmatprep.subr.bf16.mxu1 %v2677_v2  ;;  %v2685_v23 = vld [vmem:[#allocation7 + $0x50] sm:$0xff]   ;;  %v157_v24 = vpack.c.bf16 %v129_v20, %v128_v19  ;;  %v2686_v25 = vld [vmem:[#allocation7 + $0x58] sm:$0xff]   ;;  %v158_v26 = vpack.c.bf16 %v131_v22, %v130_v21  ;;  %v134_v29 = vld [vmem:[#allocation2 + $0x60] sm:$0xff]  ;;  %p3215_p10 = pnand %p3214_p9, %p3208_p6 }
  0x76   :  { %v132_v27 = vld [vmem:[#allocation2 + $0x50] sm:$0xff]  ;;  %v133_v28 = vld [vmem:[#allocation2 + $0x58] sm:$0xff]  ;;  %v135_v30 = vld [vmem:[#allocation2 + $0x68] sm:$0xff] }
  0x77   :  { %v2687_v31 = vld [vmem:[#allocation7 + $0x60] sm:$0xff]   ;;  %v159_v32 = vpack.c.bf16 %v133_v28, %v132_v27  ;;  %v160_v33 = vpack.c.bf16 %v135_v30, %v134_v29  ;;  %v2688_v34 = vld [vmem:[#allocation7 + $0x68] sm:$0xff]   ;;  %v136_v35 = vld [vmem:[#allocation2 + $0x70] sm:$0xff] }
  0x78   :  { %2471 = vmatpush3.bf16.msra.mxu1 %v2677_v2  ;;  %v137_v36 = vld [vmem:[#allocation2 + $0x78] sm:$0xff]  ;;  %v138_v37 = vld [vmem:[#allocation2 + $0x80] sm:$0xff]  ;;  %v139_v38 = vld [vmem:[#allocation2 + $0x88] sm:$0xff] }
  0x79   :  { %2472 = vmatprep.subr.bf16.mxu1 %v2678_v3  ;;  %v161_v39 = vpack.c.bf16 %v137_v36, %v136_v35  ;;  %v162_v40 = vpack.c.bf16 %v139_v38, %v138_v37  ;;  %v140_v41 = vld [vmem:[#allocation2 + $0x90] sm:$0xff]  ;;  %v141_v42 = vld [vmem:[#allocation2 + $0x98] sm:$0xff]  ;;  %v142_v43 = vld [vmem:[#allocation2 + $0xa0] sm:$0xff] }
  0x7a   :  { %v143_v44 = vld [vmem:[#allocation2 + $0xa8] sm:$0xff]  ;;  %v163_v45 = vpack.c.bf16 %v141_v42, %v140_v41  ;;  %v144_v47 = vld [vmem:[#allocation2 + $0xb0] sm:$0xff]  ;;  %v145_v48 = vld [vmem:[#allocation2 + $0xb8] sm:$0xff] }
  0x7b   :  { %v164_v46 = vpack.c.bf16 %v143_v44, %v142_v43  ;;  %v146_v49 = vld [vmem:[#allocation2 + $0xc0] sm:$0xff]  ;;  %v147_v50 = vld [vmem:[#allocation2 + $0xc8] sm:$0xff]  ;;  %v165_v51 = vpack.c.bf16 %v145_v48, %v144_v47  ;;  %v148_v53 = vld [vmem:[#allocation2 + $0xd0] sm:$0xff] }
  0x7c   :  { %2473 = vmatpush3.bf16.msra.mxu1 %v2678_v3  ;;  %v166_v52 = vpack.c.bf16 %v147_v50, %v146_v49  ;;  %v149_v54 = vld [vmem:[#allocation2 + $0xd8] sm:$0xff]  ;;  %v150_v55 = vld [vmem:[#allocation2 + $0xe0] sm:$0xff]  ;;  %v151_v56 = vld [vmem:[#allocation2 + $0xe8] sm:$0xff] }
  0x7d   :  { %2474 = vmatprep.subr.bf16.mxu1 %v2679_v7  ;;  %v167_v57 = vpack.c.bf16 %v149_v54, %v148_v53  ;;  %v168_v58 = vpack.c.bf16 %v151_v56, %v150_v55  ;;  %v152_v59 = vld [vmem:[#allocation2 + $0xf0] sm:$0xff]  ;;  %v153_v60 = vld [vmem:[#allocation2 + $0xf8] sm:$0xff]  ;;  %v2691_v0 = vld [vmem:[#allocation8 + $0x4] ss:$8 sps:$4 sm:$0xff]  }
  0x7e   :  { %v169_v61 = vpack.c.bf16 %v153_v60, %v152_v59  ;;  %v2689_v62 = vld [vmem:[#allocation7 + $0x70] sm:$0xff]   ;;  %v2690_v63 = vld [vmem:[#allocation7 + $0x78] sm:$0xff]   ;;  %v2693_v1 = vld [vmem:[#allocation8] ss:$8 sps:$4 sm:$0xff]   ;;  %840 = vmatprep.subr.bf16.mxu0 %v2691_v0 }
  0x7f   :  { %v2694_v2 = vld [vmem:[#allocation8 + $0x14] ss:$8 sps:$4 sm:$0xff]   ;;  %841 = vmatpush1.bf16.msra.mxu0 %v2693_v1  ;;  %v2696_v3 = vld [vmem:[#allocation8 + $0x10] ss:$8 sps:$4 sm:$0xff]   ;;  %v2697_v4 = vld [vmem:[#allocation8 + $0x24] ss:$8 sps:$4 sm:$0xff]  }
  0x80   :  { %2475 = vmatpush3.bf16.msra.mxu1 %v2679_v7  ;;  %842 = vmatprep.subr.bf16.mxu0 %v2694_v2  ;;  %v2699_v5 = vld [vmem:[#allocation8 + $0x20] ss:$8 sps:$4 sm:$0xff]   ;;  %v2700_v6 = vld [vmem:[#allocation8 + $0x34] ss:$8 sps:$4 sm:$0xff]  }
  0x81   :  { %2476 = vmatprep.subr.bf16.mxu1 %v2680_v8  ;;  %v3448_v7 = vld [vmem:[%s3946_s3] ss:$0 sm:$0xff] }
  0x83   :  { %843 = vmatpush1.bf16.msra.mxu0 %v2696_v3 }
  0x84   :  { %2477 = vmatpush3.bf16.msra.mxu1 %v2680_v8  ;;  %844 = vmatprep.subr.bf16.mxu0 %v2697_v4 }
  0x85   :  { %2478 = vmatprep.subr.bf16.mxu1 %v2681_v9 }
  0x87   :  { %845 = vmatpush1.bf16.msra.mxu0 %v2699_v5 }
  0x88   :  { %2479 = vmatpush3.bf16.msra.mxu1 %v2681_v9  ;;  %846 = vmatprep.subr.bf16.mxu0 %v2700_v6 }
  0x89   :  { %2480 = vmatprep.subr.bf16.mxu1 %v2682_v10 }
  0x8c   :  { %2481 = vmatpush3.bf16.msra.mxu1 %v2682_v10 }
  0x8d   :  { %2514 = vmatprep.subr.bf16.mxu1 %v2683_v15 }
  0x8f   :  { %2483 = vmatmul.mubr.bf16.vlgmr.msra.gmra.mrb[0].mxu1 %v155_v16 }
  0x90   :  { %2486 = vmatprep.mubr.bf16.mxu1 %v156_v18  ;;  %2515 = vmatpush3.bf16.msra.mxu1 %v2683_v15 }
  0x91   :  { %2516 = vmatprep.subr.bf16.mxu1 %v2684_v17 }
  0x94   :  { %2517 = vmatpush3.bf16.msra.mxu1 %v2684_v17 }
  0x95   :  { %2518 = vmatprep.subr.bf16.mxu1 %v2685_v23 }
  0x97   :  { %2487 = vmatmul.mubr.bf16.gmra.mrb[4].mxu1 %v157_v24 }
  0x98   :  { %2490 = vmatprep.mubr.bf16.mxu1 %v158_v26  ;;  %2519 = vmatpush3.bf16.msra.mxu1 %v2685_v23 }
  0x99   :  { %2520 = vmatprep.subr.bf16.mxu1 %v2686_v25 }
  0x9c   :  { %2521 = vmatpush3.bf16.msra.mxu1 %v2686_v25 }
  0x9d   :  { %2522 = vmatprep.subr.bf16.mxu1 %v2687_v31 }
  0x9f   :  { %2491 = vmatmul.mubr.bf16.gmra.mrb[8].mxu1 %v159_v32 }
  0xa0   :  { %2494 = vmatprep.mubr.bf16.mxu1 %v160_v33  ;;  %2523 = vmatpush3.bf16.msra.mxu1 %v2687_v31 }
  0xa1   :  { %2524 = vmatprep.subr.bf16.mxu1 %v2688_v34 }
  0xa4   :  { %2525 = vmatpush3.bf16.msra.mxu1 %v2688_v34 }
  0xa5   :  { %2526 = vmatprep.subr.bf16.mxu1 %v2689_v62 }
  0xa7   :  { %2495 = vmatmul.mubr.bf16.gmra.mrb[12].mxu1 %v161_v39 }
  0xa8   :  { %2498 = vmatprep.mubr.bf16.mxu1 %v162_v40  ;;  %2527 = vmatpush3.bf16.msra.mxu1 %v2689_v62 }
  0xa9   :  { %2528 = vmatprep.subr.bf16.mxu1 %v2690_v63 }
  0xac   :  { %2529 = vmatpush3.bf16.msra.mxu1 %v2690_v63 }
  0xaf   :  { %2499 = vmatmul.mubr.bf16.gmra.mrb[16].mxu1 %v163_v45 }
  0xb0   :  { %2502 = vmatprep.mubr.bf16.mxu1 %v164_v46 }
  0xb7   :  { %2503 = vmatmul.mubr.bf16.gmra.mrb[20].mxu1 %v165_v51 }
  0xb8   :  { %2506 = vmatprep.mubr.bf16.mxu1 %v166_v52 }
  0xbf   :  { %2507 = vmatmul.mubr.bf16.gmra.mrb[24].mxu1 %v167_v57 }
  0xc0   :  { %2510 = vmatprep.mubr.bf16.mxu1 %v168_v58 }
  0xc7   :  { %2511 = vmatmul.mubr.bf16.gmra.mrb[28].mxu1 %v169_v61 }
 0x162   :  { %v2484_v8 = vpop.f32.mrb[0].mxu1 }
 0x163   :  { %v284_v9 = vadd.f32 %v2484_v8, %v3448_v7  ;;  %v275_v10 = vpop.f32.mrb[1].mxu1 }
 0x164   :  { %v276_v11 = vadd.f32 %v3448_v7, %v275_v10  ;;  %v2485_v12 = vpop.f32.mrb[2].mxu1 }
 0x165   :  { %2755 = vtanh.f32 %v284_v9  ;;  %v287_v13 = vadd.f32 %v2485_v12, %v3448_v7  ;;  %v278_v14 = vpop.f32.mrb[3].mxu1 }
 0x166   :  { %2757 = vtanh.f32 %v276_v11  ;;  %v279_v15 = vadd.f32 %v3448_v7, %v278_v14 }
 0x167   :  { %2759 = vtanh.f32 %v287_v13 }
 0x168   :  { %2761 = vtanh.f32 %v279_v15 }
 0x16a   :  { %v2488_v16 = vpop.f32.mrb[4].mxu1 }
 0x16b   :  { %v300_v17 = vadd.f32 %v2488_v16, %v3448_v7  ;;  %v291_v18 = vpop.f32.mrb[5].mxu1 }
 0x16c   :  { %v292_v19 = vadd.f32 %v3448_v7, %v291_v18  ;;  %v2489_v20 = vpop.f32.mrb[6].mxu1 }
 0x16d   :  { %2763 = vtanh.f32 %v300_v17  ;;  %v303_v21 = vadd.f32 %v2489_v20, %v3448_v7  ;;  %v294_v22 = vpop.f32.mrb[7].mxu1 }
 0x16e   :  { %2765 = vtanh.f32 %v292_v19  ;;  %v295_v23 = vadd.f32 %v3448_v7, %v294_v22 }
 0x16f   :  { %v2756_v24 = vpop.eup %2755  ;;  %2767 = vtanh.f32 %v303_v21 }
 0x170   :  { %v2758_v25 = vpop.eup %2757  ;;  %2769 = vtanh.f32 %v295_v23 }
 0x171   :  { %v2760_v26 = vpop.eup %2759 }
 0x172   :  { %v2762_v27 = vpop.eup %2761  ;;  %v435_v28 = vpack.c.bf16 %v2760_v26, %v2756_v24  ;;  %v2492_v29 = vpop.f32.mrb[8].mxu1 }
 0x173   :  { %v434_v30 = vpack.c.bf16 %v2762_v27, %v2758_v25  ;;  %v316_v31 = vadd.f32 %v2492_v29, %v3448_v7  ;;  %v307_v32 = vpop.f32.mrb[9].mxu1 }
 0x174   :  { %v308_v33 = vadd.f32 %v3448_v7, %v307_v32  ;;  %v2493_v34 = vpop.f32.mrb[10].mxu1 }
 0x175   :  { %2530 = vmatprep.mubr.bf16.mxu1 %v434_v30  ;;  %2771 = vtanh.f32 %v316_v31  ;;  %v319_v35 = vadd.f32 %v2493_v34, %v3448_v7  ;;  %v310_v36 = vpop.f32.mrb[11].mxu1 }
 0x176   :  { %2531 = vmatmul.mubr.bf16.vlgmr.msra.gmra.mrb[32].mxu1 %v435_v28  ;;  %2773 = vtanh.f32 %v308_v33  ;;  %v311_v37 = vadd.f32 %v3448_v7, %v310_v36 }
 0x177   :  { %v2764_v38 = vpop.eup %2763  ;;  %2775 = vtanh.f32 %v319_v35 }
 0x178   :  { %v2766_v39 = vpop.eup %2765  ;;  %2777 = vtanh.f32 %v311_v37 }
 0x179   :  { %v2768_v40 = vpop.eup %2767 }
 0x17a   :  { %v2770_v41 = vpop.eup %2769  ;;  %v437_v42 = vpack.c.bf16 %v2768_v40, %v2764_v38  ;;  %v2496_v43 = vpop.f32.mrb[12].mxu1 }
 0x17b   :  { %v436_v44 = vpack.c.bf16 %v2770_v41, %v2766_v39  ;;  %v332_v45 = vadd.f32 %v2496_v43, %v3448_v7  ;;  %v323_v46 = vpop.f32.mrb[13].mxu1 }
 0x17c   :  { %v324_v47 = vadd.f32 %v3448_v7, %v323_v46  ;;  %v2497_v48 = vpop.f32.mrb[14].mxu1 }
 0x17d   :  { %2534 = vmatprep.mubr.bf16.mxu1 %v436_v44  ;;  %2779 = vtanh.f32 %v332_v45  ;;  %v335_v49 = vadd.f32 %v2497_v48, %v3448_v7  ;;  %v326_v50 = vpop.f32.mrb[15].mxu1 }
 0x17e   :  { %2535 = vmatmul.mubr.bf16.gmra.mrb[36].mxu1 %v437_v42  ;;  %2781 = vtanh.f32 %v324_v47  ;;  %v327_v51 = vadd.f32 %v3448_v7, %v326_v50 }
 0x17f   :  { %v2772_v52 = vpop.eup %2771  ;;  %2783 = vtanh.f32 %v335_v49 }
 0x180   :  { %v2774_v53 = vpop.eup %2773  ;;  %2785 = vtanh.f32 %v327_v51 }
 0x181   :  { %v2776_v54 = vpop.eup %2775 }
 0x182   :  { %v2778_v55 = vpop.eup %2777  ;;  %v439_v56 = vpack.c.bf16 %v2776_v54, %v2772_v52  ;;  %v2500_v57 = vpop.f32.mrb[16].mxu1 }
 0x183   :  { %v438_v58 = vpack.c.bf16 %v2778_v55, %v2774_v53  ;;  %v348_v59 = vadd.f32 %v2500_v57, %v3448_v7  ;;  %v339_v60 = vpop.f32.mrb[17].mxu1  ;;  %v2702_v57 = vld [vmem:[#allocation8 + $0x30] ss:$8 sps:$4 sm:$0xff]  }
 0x184   :  { %v340_v61 = vadd.f32 %v3448_v7, %v339_v60  ;;  %v2501_v62 = vpop.f32.mrb[18].mxu1  ;;  %847 = vmatpush1.bf16.msra.mxu0 %v2702_v57  ;;  %v2708_v60 = vld [vmem:[#allocation8 + $0x50] ss:$8 sps:$4 sm:$0xff]  }
 0x185   :  { %2538 = vmatprep.mubr.bf16.mxu1 %v438_v58  ;;  %2787 = vtanh.f32 %v348_v59  ;;  %v351_v63 = vadd.f32 %v2501_v62, %v3448_v7  ;;  %v342_v0 = vpop.f32.mrb[19].mxu1  ;;  %v2705_v58 = vld [vmem:[#allocation8 + $0x40] ss:$8 sps:$4 sm:$0xff]   ;;  %v2706_v59 = vld [vmem:[#allocation8 + $0x54] ss:$8 sps:$4 sm:$0xff]  }
 0x186   :  { %2539 = vmatmul.mubr.bf16.gmra.mrb[40].mxu1 %v439_v56  ;;  %2789 = vtanh.f32 %v340_v61  ;;  %v343_v1 = vadd.f32 %v3448_v7, %v342_v0  ;;  %v2709_v61 = vld [vmem:[#allocation8 + $0x64] ss:$8 sps:$4 sm:$0xff]   ;;  %v2711_v62 = vld [vmem:[#allocation8 + $0x60] ss:$8 sps:$4 sm:$0xff]   ;;  %v2714_v0 = vld [vmem:[#allocation8 + $0x70] ss:$8 sps:$4 sm:$0xff]  }
 0x187   :  { %v2780_v2 = vpop.eup %2779  ;;  %2791 = vtanh.f32 %v351_v63  ;;  %v2712_v63 = vld [vmem:[#allocation8 + $0x74] ss:$8 sps:$4 sm:$0xff]  }
 0x188   :  { %v2782_v3 = vpop.eup %2781  ;;  %2793 = vtanh.f32 %v343_v1  ;;  %v3273_v1 = vmov 0  }
 0x189   :  { %v2784_v4 = vpop.eup %2783  ;;  %872 = vmatprep.mubr.bf16.mxu0 %v3273_v1 }
 0x18a   :  { %v2786_v5 = vpop.eup %2785  ;;  %v441_v6 = vpack.c.bf16 %v2784_v4, %v2780_v2  ;;  %v2504_v8 = vpop.f32.mrb[20].mxu1  ;;  %v3486_v2 = vld [vmem:[%s3946_s3 + $0x1] ss:$0 sm:$0xff] }
 0x18b   :  { %v440_v9 = vpack.c.bf16 %v2786_v5, %v2782_v3  ;;  %v364_v10 = vadd.f32 %v2504_v8, %v3448_v7  ;;  %v355_v11 = vpop.f32.mrb[21].mxu1 }
 0x18c   :  { %v356_v12 = vadd.f32 %v3448_v7, %v355_v11  ;;  %v2505_v13 = vpop.f32.mrb[22].mxu1 }
 0x18d   :  { %2542 = vmatprep.mubr.bf16.mxu1 %v440_v9  ;;  %2795 = vtanh.f32 %v364_v10  ;;  %v367_v14 = vadd.f32 %v2505_v13, %v3448_v7  ;;  %v358_v15 = vpop.f32.mrb[23].mxu1 }
 0x18e   :  { %2543 = vmatmul.mubr.bf16.gmra.mrb[44].mxu1 %v441_v6  ;;  %2797 = vtanh.f32 %v356_v12  ;;  %v359_v16 = vadd.f32 %v3448_v7, %v358_v15 }
 0x18f   :  { %v2788_v17 = vpop.eup %2787  ;;  %2799 = vtanh.f32 %v367_v14 }
 0x190   :  { %v2790_v18 = vpop.eup %2789  ;;  %2801 = vtanh.f32 %v359_v16 }
 0x191   :  { %v2792_v19 = vpop.eup %2791 }
 0x192   :  { %v2794_v20 = vpop.eup %2793  ;;  %v443_v21 = vpack.c.bf16 %v2792_v19, %v2788_v17  ;;  %v2508_v22 = vpop.f32.mrb[24].mxu1  ;;  %v2715_v19 = vld [vmem:[#allocation10] sm:$0xff]  }
 0x193   :  { %v442_v23 = vpack.c.bf16 %v2794_v20, %v2790_v18  ;;  %v380_v24 = vadd.f32 %v2508_v22, %v3448_v7  ;;  %v371_v25 = vpop.f32.mrb[25].mxu1  ;;  %v2716_v20 = vld [vmem:[#allocation10 + $0x8] sm:$0xff]   ;;  %2562 = vmatprep.subr.bf16.mxu1 %v2715_v19 }
 0x194   :  { %v372_v26 = vadd.f32 %v3448_v7, %v371_v25  ;;  %v2509_v27 = vpop.f32.mrb[26].mxu1  ;;  %2563 = vmatpush3.bf16.msra.mxu1 %v2715_v19  ;;  %v2717_v25 = vld [vmem:[#allocation10 + $0x10] sm:$0xff]  }
 0x195   :  { %2546 = vmatprep.mubr.bf16.mxu1 %v442_v23  ;;  %2803 = vtanh.f32 %v380_v24  ;;  %v383_v28 = vadd.f32 %v2509_v27, %v3448_v7  ;;  %v374_v29 = vpop.f32.mrb[27].mxu1  ;;  %2564 = vmatprep.subr.bf16.mxu1 %v2716_v20 }
 0x196   :  { %2547 = vmatmul.mubr.bf16.gmra.mrb[48].mxu1 %v443_v21  ;;  %2805 = vtanh.f32 %v372_v26  ;;  %v375_v30 = vadd.f32 %v3448_v7, %v374_v29 }
 0x197   :  { %v2796_v31 = vpop.eup %2795  ;;  %2807 = vtanh.f32 %v383_v28 }
 0x198   :  { %v2798_v32 = vpop.eup %2797  ;;  %2809 = vtanh.f32 %v375_v30  ;;  %2565 = vmatpush3.bf16.msra.mxu1 %v2716_v20 }
 0x199   :  { %v2800_v33 = vpop.eup %2799  ;;  %2566 = vmatprep.subr.bf16.mxu1 %v2717_v25 }
 0x19a   :  { %v2802_v34 = vpop.eup %2801  ;;  %v445_v35 = vpack.c.bf16 %v2800_v33, %v2796_v31  ;;  %v2512_v36 = vpop.f32.mrb[28].mxu1 }
 0x19b   :  { %v444_v37 = vpack.c.bf16 %v2802_v34, %v2798_v32  ;;  %v396_v38 = vadd.f32 %v2512_v36, %v3448_v7  ;;  %v387_v39 = vpop.f32.mrb[29].mxu1  ;;  %v2718_v36 = vld [vmem:[#allocation10 + $0x18] sm:$0xff]  }
 0x19c   :  { %v388_v40 = vadd.f32 %v3448_v7, %v387_v39  ;;  %v2513_v41 = vpop.f32.mrb[30].mxu1  ;;  %2567 = vmatpush3.bf16.msra.mxu1 %v2717_v25 }
 0x19d   :  { %2550 = vmatprep.mubr.bf16.mxu1 %v444_v37  ;;  %2811 = vtanh.f32 %v396_v38  ;;  %v399_v42 = vadd.f32 %v2513_v41, %v3448_v7  ;;  %v390_v43 = vpop.f32.mrb[31].mxu1  ;;  %2568 = vmatprep.subr.bf16.mxu1 %v2718_v36 }
 0x19e   :  { %2551 = vmatmul.mubr.bf16.gmra.mrb[52].mxu1 %v445_v35  ;;  %2813 = vtanh.f32 %v388_v40  ;;  %v391_v44 = vadd.f32 %v3448_v7, %v390_v43  ;;  %v2703_v7 = vld [vmem:[#allocation8 + $0x44] ss:$8 sps:$4 sm:$0xff]  }
 0x19f   :  { %v2804_v45 = vpop.eup %2803  ;;  %2815 = vtanh.f32 %v399_v42  ;;  %848 = vmatprep.subr.bf16.mxu0 %v2703_v7 }
 0x1a0   :  { %v2806_v46 = vpop.eup %2805  ;;  %2817 = vtanh.f32 %v391_v44  ;;  %849 = vmatpush1.bf16.msra.mxu0 %v2705_v58  ;;  %2569 = vmatpush3.bf16.msra.mxu1 %v2718_v36 }
 0x1a1   :  { %v2808_v47 = vpop.eup %2807  ;;  %850 = vmatprep.subr.bf16.mxu0 %v2706_v59 }
 0x1a2   :  { %v2810_v48 = vpop.eup %2809  ;;  %v447_v49 = vpack.c.bf16 %v2808_v47, %v2804_v45 }
 0x1a3   :  { %v446_v50 = vpack.c.bf16 %v2810_v48, %v2806_v46 }
 0x1a4   :  { %851 = vmatpush1.bf16.msra.mxu0 %v2708_v60 }
 0x1a5   :  { %2554 = vmatprep.mubr.bf16.mxu1 %v446_v50  ;;  %852 = vmatprep.subr.bf16.mxu0 %v2709_v61 }
 0x1a6   :  { %2555 = vmatmul.mubr.bf16.gmra.mrb[56].mxu1 %v447_v49 }
 0x1a7   :  { %v2812_v51 = vpop.eup %2811 }
 0x1a8   :  { %v2814_v52 = vpop.eup %2813  ;;  %853 = vmatpush1.bf16.msra.mxu0 %v2711_v62 }
 0x1a9   :  { %v2816_v53 = vpop.eup %2815  ;;  %854 = vmatprep.subr.bf16.mxu0 %v2712_v63 }
 0x1aa   :  { %v2818_v54 = vpop.eup %2817  ;;  %v449_v55 = vpack.c.bf16 %v2816_v53, %v2812_v51 }
 0x1ab   :  { %v448_v56 = vpack.c.bf16 %v2818_v54, %v2814_v52 }
 0x1ac   :  { %855 = vmatpush1.bf16.msra.mxu0 %v2714_v0 }
 0x1ad   :  { %2558 = vmatprep.mubr.bf16.mxu1 %v448_v56 }
 0x1ae   :  { %2559 = vmatmul.mubr.bf16.gmra.mrb[60].mxu1 %v449_v55 }
 0x249   :  { %v2532_v3 = vpop.f32.mrb[32].mxu1 }
 0x24a   :  { %v566_v4 = vadd.f32 %v2532_v3, %v3486_v2  ;;  %v557_v5 = vpop.f32.mrb[33].mxu1 }
 0x24b   :  { %v558_v6 = vadd.f32 %v3486_v2, %v557_v5  ;;  %v2533_v8 = vpop.f32.mrb[34].mxu1 }
 0x24c   :  { %2819 = vtanh.f32 %v566_v4  ;;  %v569_v9 = vadd.f32 %v2533_v8, %v3486_v2  ;;  %v560_v10 = vpop.f32.mrb[35].mxu1 }
 0x24d   :  { %2821 = vtanh.f32 %v558_v6  ;;  %v561_v11 = vadd.f32 %v3486_v2, %v560_v10 }
 0x24e   :  { %2823 = vtanh.f32 %v569_v9 }
 0x24f   :  { %2825 = vtanh.f32 %v561_v11 }
 0x251   :  { %v2536_v12 = vpop.f32.mrb[36].mxu1 }
 0x252   :  { %v582_v13 = vadd.f32 %v2536_v12, %v3486_v2  ;;  %v573_v14 = vpop.f32.mrb[37].mxu1 }
 0x253   :  { %v574_v15 = vadd.f32 %v3486_v2, %v573_v14  ;;  %v2537_v16 = vpop.f32.mrb[38].mxu1 }
 0x254   :  { %2827 = vtanh.f32 %v582_v13  ;;  %v585_v17 = vadd.f32 %v2537_v16, %v3486_v2  ;;  %v576_v18 = vpop.f32.mrb[39].mxu1 }
 0x255   :  { %2829 = vtanh.f32 %v574_v15  ;;  %v577_v21 = vadd.f32 %v3486_v2, %v576_v18 }
 0x256   :  { %v2820_v22 = vpop.eup %2819  ;;  %2831 = vtanh.f32 %v585_v17 }
 0x257   :  { %v2822_v23 = vpop.eup %2821  ;;  %2833 = vtanh.f32 %v577_v21 }
 0x258   :  { %v2824_v24 = vpop.eup %2823 }
 0x259   :  { %v2826_v26 = vpop.eup %2825  ;;  %v2540_v27 = vpop.f32.mrb[40].mxu1  ;;  %v717_v28 = vpack.c.bf16 %v2824_v24, %v2820_v22 }
 0x25a   :  { %v716_v29 = vpack.c.bf16 %v2826_v26, %v2822_v23  ;;  %v598_v30 = vadd.f32 %v2540_v27, %v3486_v2  ;;  %v589_v31 = vpop.f32.mrb[41].mxu1 }
 0x25b   :  { %v590_v32 = vadd.f32 %v3486_v2, %v589_v31  ;;  %v2541_v33 = vpop.f32.mrb[42].mxu1 }
 0x25c   :  { %873 = vmatmul.mubr.bf16.vlgmr.msra.gmra.mrb[0].mxu0 %v716_v29  ;;  %2835 = vtanh.f32 %v598_v30  ;;  %v601_v34 = vadd.f32 %v2541_v33, %v3486_v2  ;;  %v592_v35 = vpop.f32.mrb[43].mxu1 }
 0x25d   :  { %2837 = vtanh.f32 %v590_v32  ;;  %882 = vmatprep.mubr.bf16.mxu0 %v3273_v1  ;;  %v593_v37 = vadd.f32 %v3486_v2, %v592_v35 }
 0x25e   :  { %v2828_v38 = vpop.eup %2827  ;;  %2839 = vtanh.f32 %v601_v34 }
 0x25f   :  { %v2830_v39 = vpop.eup %2829  ;;  %2841 = vtanh.f32 %v593_v37 }
 0x260   :  { %v2832_v40 = vpop.eup %2831 }
 0x261   :  { %v2834_v41 = vpop.eup %2833  ;;  %v2544_v42 = vpop.f32.mrb[44].mxu1  ;;  %v719_v43 = vpack.c.bf16 %v2832_v40, %v2828_v38 }
 0x262   :  { %v718_v44 = vpack.c.bf16 %v2834_v41, %v2830_v39  ;;  %v614_v45 = vadd.f32 %v2544_v42, %v3486_v2  ;;  %v605_v46 = vpop.f32.mrb[45].mxu1 }
 0x263   :  { %v606_v47 = vadd.f32 %v3486_v2, %v605_v46  ;;  %v2545_v48 = vpop.f32.mrb[46].mxu1 }
 0x264   :  { %883 = vmatmul.mubr.bf16.gmra.mrb[4].mxu0 %v717_v28  ;;  %2843 = vtanh.f32 %v614_v45  ;;  %v617_v49 = vadd.f32 %v2545_v48, %v3486_v2  ;;  %v608_v50 = vpop.f32.mrb[47].mxu1 }
 0x265   :  { %892 = vmatprep.mubr.bf16.mxu0 %v3273_v1  ;;  %2845 = vtanh.f32 %v606_v47  ;;  %v609_v51 = vadd.f32 %v3486_v2, %v608_v50 }
 0x266   :  { %v3506_v52 = vpop.eup %2835  ;;  %2847 = vtanh.f32 %v617_v49 }
 0x267   :  { %v2838_v53 = vpop.eup %2837  ;;  %2849 = vtanh.f32 %v609_v51 }
 0x268   :  { %v3508_v54 = vpop.eup %2839 }
 0x269   :  { %v2842_v55 = vpop.eup %2841  ;;  %v2548_v56 = vpop.f32.mrb[48].mxu1  ;;  %v721_v57 = vpack.c.bf16 %v3508_v54, %v3506_v52 }
 0x26a   :  { %v720_v7 = vpack.c.bf16 %v2842_v55, %v2838_v53  ;;  %v630_v58 = vadd.f32 %v2548_v56, %v3486_v2  ;;  %v621_v59 = vpop.f32.mrb[49].mxu1 }
 0x26b   :  { %v622_v60 = vadd.f32 %v3486_v2, %v621_v59  ;;  %v2549_v61 = vpop.f32.mrb[50].mxu1  ;;  %v2722_v59 = vld [vmem:[#allocation10 + $0x38] sm:$0xff]  }
 0x26c   :  { %893 = vmatmul.mubr.bf16.gmra.mrb[8].mxu0 %v718_v44  ;;  %2851 = vtanh.f32 %v630_v58  ;;  %v633_v62 = vadd.f32 %v2549_v61, %v3486_v2  ;;  %v624_v63 = vpop.f32.mrb[51].mxu1  ;;  %v2721_v58 = vld [vmem:[#allocation10 + $0x30] sm:$0xff]  }
 0x26d   :  { %902 = vmatprep.mubr.bf16.mxu0 %v3273_v1  ;;  %2853 = vtanh.f32 %v622_v60  ;;  %v625_v0 = vadd.f32 %v3486_v2, %v624_v63  ;;  %v750_v60 = vlaneseq  ;;  %v748_v63 = vld [vmem:[%s3948_s5] sm:$0x3] }
 0x26e   :  { %v3517_v3 = vpop.eup %2843  ;;  %2855 = vtanh.f32 %v633_v62 }
 0x26f   :  { %v3519_v4 = vpop.eup %2845  ;;  %2857 = vtanh.f32 %v625_v0  ;;  %v3560_v61 = vshrl.u32 %v750_v60, 7 }
 0x270   :  { %v3521_v5 = vpop.eup %2847 }
 0x271   :  { %v3523_v6 = vpop.eup %2849  ;;  %v2552_v8 = vpop.f32.mrb[52].mxu1  ;;  %v723_v9 = vpack.c.bf16 %v3521_v5, %v3517_v3  ;;  %v752_v62 = vsub.s32 0, %v3560_v61  ;;  %v756_v0 = vsub.s32 1, %v3560_v61 }
 0x272   :  { %v722_v10 = vpack.c.bf16 %v3523_v6, %v3519_v4  ;;  %v646_v11 = vadd.f32 %v2552_v8, %v3486_v2  ;;  %v637_v12 = vpop.f32.mrb[53].mxu1 }
 0x273   :  { %v638_v13 = vadd.f32 %v3486_v2, %v637_v12  ;;  %v2553_v14 = vpop.f32.mrb[54].mxu1  ;;  %v3569_v3 = vrot.slane %v748_v63, %v752_v62  ;;  %v3573_v4 = vrot.slane %v748_v63, %v756_v0 }
 0x274   :  { %903 = vmatmul.mubr.bf16.gmra.mrb[12].mxu0 %v719_v43  ;;  %2859 = vtanh.f32 %v646_v11  ;;  %v649_v15 = vadd.f32 %v2553_v14, %v3486_v2  ;;  %v640_v16 = vpop.f32.mrb[55].mxu1 }
 0x275   :  { %912 = vmatprep.mubr.bf16.mxu0 %v3273_v1  ;;  %2861 = vtanh.f32 %v638_v13  ;;  %v641_v17 = vadd.f32 %v3486_v2, %v640_v16 }
 0x276   :  { %v2852_v18 = vpop.eup %2851  ;;  %2863 = vtanh.f32 %v649_v15 }
 0x277   :  { %v2854_v19 = vpop.eup %2853  ;;  %2865 = vtanh.f32 %v641_v17 }
 0x278   :  { %v2856_v20 = vpop.eup %2855 }
 0x279   :  { %v2858_v21 = vpop.eup %2857  ;;  %v2556_v22 = vpop.f32.mrb[56].mxu1  ;;  %v725_v23 = vpack.c.bf16 %v2856_v20, %v2852_v18 }
 0x27a   :  { %v724_v24 = vpack.c.bf16 %v2858_v21, %v2854_v19  ;;  %v662_v25 = vadd.f32 %v2556_v22, %v3486_v2  ;;  %v653_v26 = vpop.f32.mrb[57].mxu1 }
 0x27b   :  { %v654_v27 = vadd.f32 %v3486_v2, %v653_v26  ;;  %v2557_v28 = vpop.f32.mrb[58].mxu1 }
 0x27c   :  { %913 = vmatmul.mubr.bf16.gmra.mrb[16].mxu0 %v720_v7  ;;  %2867 = vtanh.f32 %v662_v25  ;;  %v665_v29 = vadd.f32 %v2557_v28, %v3486_v2  ;;  %v656_v30 = vpop.f32.mrb[59].mxu1  ;;  %v2720_v7 = vld [vmem:[#allocation10 + $0x28] sm:$0xff]  }
 0x27d   :  { %922 = vmatprep.mubr.bf16.mxu0 %v3273_v1  ;;  %2869 = vtanh.f32 %v654_v27  ;;  %v657_v31 = vadd.f32 %v3486_v2, %v656_v30 }
 0x27e   :  { %v2860_v32 = vpop.eup %2859  ;;  %2871 = vtanh.f32 %v665_v29 }
 0x27f   :  { %v2862_v33 = vpop.eup %2861  ;;  %2873 = vtanh.f32 %v657_v31  ;;  %v1033_v31 = vld [vmem:[#allocation5] sm:$0xff] }
 0x280   :  { %v2864_v34 = vpop.eup %2863 }
 0x281   :  { %v2866_v35 = vpop.eup %2865  ;;  %v2560_v36 = vpop.f32.mrb[60].mxu1  ;;  %v727_v37 = vpack.c.bf16 %v2864_v34, %v2860_v32 }
 0x282   :  { %v726_v38 = vpack.c.bf16 %v2866_v35, %v2862_v33  ;;  %v678_v39 = vadd.f32 %v2560_v36, %v3486_v2  ;;  %v669_v40 = vpop.f32.mrb[61].mxu1 }
 0x283   :  { %v670_v41 = vadd.f32 %v3486_v2, %v669_v40  ;;  %v2561_v42 = vpop.f32.mrb[62].mxu1 }
 0x284   :  { %923 = vmatmul.mubr.bf16.gmra.mrb[20].mxu0 %v721_v57  ;;  %2875 = vtanh.f32 %v678_v39  ;;  %v681_v43 = vadd.f32 %v2561_v42, %v3486_v2  ;;  %v672_v44 = vpop.f32.mrb[63].mxu1 }
 0x285   :  { %932 = vmatprep.mubr.bf16.mxu0 %v3273_v1  ;;  %2877 = vtanh.f32 %v670_v41  ;;  %v673_v45 = vadd.f32 %v3486_v2, %v672_v44  ;;  %v2719_v2 = vld [vmem:[#allocation10 + $0x20] sm:$0xff]  }
 0x286   :  { %v2868_v46 = vpop.eup %2867  ;;  %2879 = vtanh.f32 %v681_v43  ;;  %2570 = vmatprep.subr.bf16.mxu1 %v2719_v2  ;;  %v3597_v41 = vld [vmem:[#allocation10 + $0x40] sm:$0xff]  }
 0x287   :  { %v2870_v47 = vpop.eup %2869  ;;  %2881 = vtanh.f32 %v673_v45  ;;  %2571 = vmatpush3.bf16.msra.mxu1 %v2719_v2 }
 0x288   :  { %v2872_v48 = vpop.eup %2871  ;;  %2572 = vmatprep.subr.bf16.mxu1 %v2720_v7 }
 0x289   :  { %v2874_v49 = vpop.eup %2873  ;;  %v729_v50 = vpack.c.bf16 %v2872_v48, %v2868_v46 }
 0x28a   :  { %v728_v51 = vpack.c.bf16 %v2874_v49, %v2870_v47 }
 0x28b   :  { %2573 = vmatpush3.bf16.msra.mxu1 %v2720_v7 }
 0x28c   :  { %933 = vmatmul.mubr.bf16.gmra.mrb[24].mxu0 %v722_v10  ;;  %2574 = vmatprep.subr.bf16.mxu1 %v2721_v58 }
 0x28d   :  { %942 = vmatprep.mubr.bf16.mxu0 %v3273_v1 }
 0x28e   :  { %v2876_v52 = vpop.eup %2875 }
 0x28f   :  { %v2878_v53 = vpop.eup %2877  ;;  %2575 = vmatpush3.bf16.msra.mxu1 %v2721_v58 }
 0x290   :  { %v2880_v54 = vpop.eup %2879  ;;  %2576 = vmatprep.subr.bf16.mxu1 %v2722_v59 }
 0x291   :  { %v2882_v55 = vpop.eup %2881  ;;  %v731_v56 = vpack.c.bf16 %v2880_v54, %v2876_v52 }
 0x292   :  { %v730_v57 = vpack.c.bf16 %v2882_v55, %v2878_v53 }
 0x293   :  { %2577 = vmatpush3.bf16.msra.mxu1 %v2722_v59 }
 0x294   :  { %943 = vmatmul.mubr.bf16.gmra.mrb[28].mxu0 %v723_v9  ;;  %2610 = vmatprep.subr.bf16.mxu1 %v3597_v41 }
 0x295   :  { %952 = vmatprep.mubr.bf16.mxu0 %v3273_v1 }
 0x29c   :  { %953 = vmatmul.mubr.bf16.gmra.mrb[32].mxu0 %v724_v24 }
 0x29d   :  { %962 = vmatprep.mubr.bf16.mxu0 %v3273_v1 }
 0x2a4   :  { %963 = vmatmul.mubr.bf16.gmra.mrb[36].mxu0 %v725_v23 }
 0x2a5   :  { %972 = vmatprep.mubr.bf16.mxu0 %v3273_v1 }
 0x2ac   :  { %973 = vmatmul.mubr.bf16.gmra.mrb[40].mxu0 %v726_v38 }
 0x2ad   :  { %982 = vmatprep.mubr.bf16.mxu0 %v3273_v1 }
 0x2b4   :  { %983 = vmatmul.mubr.bf16.gmra.mrb[44].mxu0 %v727_v37  ;;  %v1034_v37 = vld [vmem:[#allocation5 + $0x8] sm:$0xff] }
 0x2b5   :  { %992 = vmatprep.mubr.bf16.mxu0 %v3273_v1 }
 0x2bc   :  { %993 = vmatmul.mubr.bf16.gmra.mrb[48].mxu0 %v728_v51 }
 0x2bd   :  { %1002 = vmatprep.mubr.bf16.mxu0 %v3273_v1 }
 0x2c4   :  { %1003 = vmatmul.mubr.bf16.gmra.mrb[52].mxu0 %v729_v50  ;;  %v1035_v50 = vld [vmem:[#allocation5 + $0x10] sm:$0xff] }
 0x2c5   :  { %1012 = vmatprep.mubr.bf16.mxu0 %v3273_v1 }
 0x2cc   :  { %1013 = vmatmul.mubr.bf16.gmra.mrb[56].mxu0 %v730_v57  ;;  %v1036_v57 = vld [vmem:[#allocation5 + $0x18] sm:$0xff] }
 0x2cd   :  { %1022 = vmatprep.mubr.bf16.mxu0 %v3273_v1 }
 0x2d4   :  { %1023 = vmatmul.mubr.bf16.gmra.mrb[60].mxu0 %v731_v56 }
 0x2d5   :  { %2039 = vmatprep.mubr.bf16.mxu0 %v3273_v1 }
 0x32f   :  { %v874_v5 = vpop.f32.mrb[0].mxu0 }
 0x330   :  { %v875_v6 = vadd.f32 %v874_v5, %v3569_v3  ;;  %v876_v8 = vpop.f32.mrb[1].mxu0 }
 0x331   :  { %v877_v9 = vadd.f32 %v876_v8, %v3573_v4  ;;  %v878_v10 = vpop.f32.mrb[2].mxu0 }
 0x332   :  { %1225 = vst [vmem:[#allocation13] sm:$0xff] %v875_v6  ;;  %v879_v11 = vadd.f32 %v878_v10, %v3569_v3  ;;  %v880_v12 = vpop.f32.mrb[3].mxu0 }
 0x333   :  { %v1065_v13 = vmul.f32 0.5, %v877_v9  ;;  %1226 = vst [vmem:[#allocation13 + $0x8] sm:$0xff] %v877_v9  ;;  %v881_v14 = vadd.f32 %v880_v12, %v3573_v4 }
 0x334   :  { %1227 = vst [vmem:[#allocation13 + $0x18] sm:$0xff] %v879_v11 }
 0x335   :  { %v1097_v15 = vmul.f32 1.442695, %v1065_v13  ;;  %v1066_v16 = vmul.f32 0.5, %v881_v14  ;;  %1228 = vst [vmem:[#allocation13 + $0x20] sm:$0xff] %v881_v14 }
 0x337   :  { %2883 = vpow2.f32 %v1097_v15  ;;  %v1099_v17 = vmul.f32 1.442695, %v1066_v16  ;;  %v884_v18 = vpop.f32.mrb[4].mxu0  ;;  %v1037_v15 = vld [vmem:[#allocation5 + $0x20] sm:$0xff] }
 0x338   :  { %v3580_v19 = vadd.f32 %v884_v18, %v3569_v3  ;;  %v886_v20 = vpop.f32.mrb[5].mxu0 }
 0x339   :  { %2885 = vpow2.f32 %v1099_v17  ;;  %v887_v21 = vadd.f32 %v886_v20, %v3573_v4  ;;  %v888_v22 = vpop.f32.mrb[6].mxu0  ;;  %v2724_v20 = vld [vmem:[#allocation10 + $0x48] sm:$0xff]  }
 0x33a   :  { %1229 = vst [vmem:[#allocation13 + $0x30] sm:$0xff] %v3580_v19  ;;  %v3585_v23 = vadd.f32 %v888_v22, %v3569_v3  ;;  %v890_v24 = vpop.f32.mrb[7].mxu0 }
 0x33b   :  { %v1067_v25 = vmul.f32 0.5, %v887_v21  ;;  %1230 = vst [vmem:[#allocation13 + $0x38] sm:$0xff] %v887_v21  ;;  %v891_v26 = vadd.f32 %v890_v24, %v3573_v4  ;;  %v1038_v24 = vld [vmem:[#allocation5 + $0x28] sm:$0xff] }
 0x33c   :  { %1231 = vst [vmem:[#allocation13 + $0x48] sm:$0xff] %v3585_v23 }
 0x33d   :  { %v1101_v27 = vmul.f32 1.442695, %v1067_v25  ;;  %v1068_v28 = vmul.f32 0.5, %v891_v26  ;;  %1232 = vst [vmem:[#allocation13 + $0x50] sm:$0xff] %v891_v26 }
 0x33f   :  { %2887 = vpow2.f32 %v1101_v27  ;;  %v1103_v29 = vmul.f32 1.442695, %v1068_v28  ;;  %v894_v30 = vpop.f32.mrb[8].mxu0 }
 0x340   :  { %v3590_v32 = vadd.f32 %v894_v30, %v3569_v3  ;;  %v896_v33 = vpop.f32.mrb[9].mxu0 }
 0x341   :  { %v2884_v34 = vpop.eup %2883  ;;  %2889 = vpow2.f32 %v1103_v29  ;;  %v897_v35 = vadd.f32 %v896_v33, %v3573_v4  ;;  %v898_v36 = vpop.f32.mrb[10].mxu0  ;;  %v2725_v33 = vld [vmem:[#allocation10 + $0x50] sm:$0xff]  }
 0x342   :  { %1233 = vst [vmem:[#allocation13 + $0x60] sm:$0xff] %v3590_v32  ;;  %v3595_v38 = vadd.f32 %v898_v36, %v3569_v3  ;;  %v900_v39 = vpop.f32.mrb[11].mxu0  ;;  %v1161_v40 = vmul.f32 %v2884_v34, %v1033_v31 }
 0x343   :  { %v2886_v42 = vpop.eup %2885  ;;  %v1069_v43 = vmul.f32 0.5, %v897_v35  ;;  %1234 = vst [vmem:[#allocation13 + $0x68] sm:$0xff] %v897_v35  ;;  %v901_v44 = vadd.f32 %v900_v39, %v3573_v4 }
 0x344   :  { %1235 = vst [vmem:[#allocation13 + $0x78] sm:$0xff] %v3595_v38  ;;  %v1162_v45 = vmul.f32 %v2886_v42, %v1034_v37  ;;  %v1193_v46 = vadd.f32 %v1161_v40, %v875_v6  ;;  %v1039_v40 = vld [vmem:[#allocation5 + $0x30] sm:$0xff] }
 0x345   :  { %v1105_v47 = vmul.f32 1.442695, %v1069_v43  ;;  %v1070_v48 = vmul.f32 0.5, %v901_v44  ;;  %1236 = vst [vmem:[#allocation13 + $0x80] sm:$0xff] %v901_v44 }
 0x346   :  { %v1194_v49 = vadd.f32 %v1162_v45, %v879_v11  ;;  %1289 = vst [vmem:[#allocation13 + $0x10] sm:$0xff] %v1193_v46 }
 0x347   :  { %2891 = vpow2.f32 %v1105_v47  ;;  %v1107_v51 = vmul.f32 1.442695, %v1070_v48  ;;  %v904_v52 = vpop.f32.mrb[12].mxu0 }
 0x348   :  { %v3603_v53 = vadd.f32 %v904_v52, %v3569_v3  ;;  %v906_v54 = vpop.f32.mrb[13].mxu0  ;;  %1290 = vst [vmem:[#allocation13 + $0x28] sm:$0xff] %v1194_v49  ;;  %v1321_v55 = vpack.c.bf16 %v1194_v49, %v1193_v46 }
 0x349   :  { %v2888_v56 = vpop.eup %2887  ;;  %2893 = vpow2.f32 %v1107_v51  ;;  %v907_v2 = vadd.f32 %v906_v54, %v3573_v4  ;;  %v908_v7 = vpop.f32.mrb[14].mxu0 }
 0x34a   :  { %v1163_v58 = vmul.f32 %v2888_v56, %v1035_v50  ;;  %1237 = vst [vmem:[#allocation13 + $0x90] sm:$0xff] %v3603_v53  ;;  %v3608_v59 = vadd.f32 %v908_v7, %v3569_v3  ;;  %v910_v60 = vpop.f32.mrb[15].mxu0  ;;  %2578 = vmatprep.mubr.bf16.mxu1 %v1321_v55  ;;  %v2727_v56 = vld [vmem:[#allocation10 + $0x60] sm:$0xff]  }
 0x34b   :  { %v2890_v63 = vpop.eup %2889  ;;  %v1071_v5 = vmul.f32 0.5, %v907_v2  ;;  %1238 = vst [vmem:[#allocation13 + $0x98] sm:$0xff] %v907_v2  ;;  %v911_v6 = vadd.f32 %v910_v60, %v3573_v4 }
 0x34c   :  { %v1164_v8 = vmul.f32 %v2890_v63, %v1036_v57  ;;  %1239 = vst [vmem:[#allocation13 + $0xa8] sm:$0xff] %v3608_v59  ;;  %v1195_v9 = vadd.f32 %v1163_v58, %v3580_v19  ;;  %v1041_v63 = vld [vmem:[#allocation5 + $0x40] sm:$0xff] }
 0x34d   :  { %v1109_v10 = vmul.f32 1.442695, %v1071_v5  ;;  %v1072_v11 = vmul.f32 0.5, %v911_v6  ;;  %1240 = vst [vmem:[#allocation13 + $0xb0] sm:$0xff] %v911_v6 }
 0x34e   :  { %v1196_v12 = vadd.f32 %v1164_v8, %v3585_v23  ;;  %1291 = vst [vmem:[#allocation13 + $0x40] sm:$0xff] %v1195_v9 }
 0x34f   :  { %2895 = vpow2.f32 %v1109_v10  ;;  %v1111_v13 = vmul.f32 1.442695, %v1072_v11  ;;  %v914_v14 = vpop.f32.mrb[16].mxu0 }
 0x350   :  { %v3615_v16 = vadd.f32 %v914_v14, %v3569_v3  ;;  %v916_v17 = vpop.f32.mrb[17].mxu0  ;;  %1292 = vst [vmem:[#allocation13 + $0x58] sm:$0xff] %v1196_v12  ;;  %v1322_v18 = vpack.c.bf16 %v1196_v12, %v1195_v9 }
 0x351   :  { %v2892_v21 = vpop.eup %2891  ;;  %2897 = vpow2.f32 %v1111_v13  ;;  %v917_v19 = vadd.f32 %v916_v17, %v3573_v4  ;;  %v918_v22 = vpop.f32.mrb[18].mxu0 }
 0x352   :  { %1241 = vst [vmem:[#allocation13 + $0xc0] sm:$0xff] %v3615_v16  ;;  %v3620_v23 = vadd.f32 %v918_v22, %v3569_v3  ;;  %v920_v25 = vpop.f32.mrb[19].mxu0  ;;  %2579 = vmatmul.mubr.bf16.vlgmr.msra.gmra.mrb[64].mxu1 %v1322_v18  ;;  %v1165_v26 = vmul.f32 %v2892_v21, %v1037_v15 }
 0x353   :  { %v2894_v27 = vpop.eup %2893  ;;  %v1073_v28 = vmul.f32 0.5, %v917_v19  ;;  %1242 = vst [vmem:[#allocation13 + $0xc8] sm:$0xff] %v917_v19  ;;  %v921_v29 = vadd.f32 %v920_v25, %v3573_v4  ;;  %2611 = vmatpush3.bf16.msra.mxu1 %v3597_v41 }
 0x354   :  { %1243 = vst [vmem:[#allocation13 + $0xd8] sm:$0xff] %v3620_v23  ;;  %v1166_v30 = vmul.f32 %v2894_v27, %v1038_v24  ;;  %v1197_v31 = vadd.f32 %v1165_v26, %v3590_v32  ;;  %2612 = vmatprep.subr.bf16.mxu1 %v2724_v20  ;;  %v2726_v32 = vld [vmem:[#allocation10 + $0x58] sm:$0xff]   ;;  %v1043_v27 = vld [vmem:[#allocation5 + $0x50] sm:$0xff] }
 0x355   :  { %v1113_v34 = vmul.f32 1.442695, %v1073_v28  ;;  %v1074_v35 = vmul.f32 0.5, %v921_v29  ;;  %1244 = vst [vmem:[#allocation13 + $0xe0] sm:$0xff] %v921_v29 }
 0x356   :  { %v1198_v36 = vadd.f32 %v1166_v30, %v3595_v38  ;;  %1293 = vst [vmem:[#allocation13 + $0x70] sm:$0xff] %v1197_v31  ;;  %v1040_v38 = vld [vmem:[#allocation5 + $0x38] sm:$0xff] }
 0x357   :  { %2899 = vpow2.f32 %v1113_v34  ;;  %v1115_v37 = vmul.f32 1.442695, %v1074_v35  ;;  %v924_v39 = vpop.f32.mrb[20].mxu0  ;;  %2613 = vmatpush3.bf16.msra.mxu1 %v2724_v20  ;;  %v1044_v34 = vld [vmem:[#allocation5 + $0x58] sm:$0xff] }
 0x358   :  { %v3628_v41 = vadd.f32 %v924_v39, %v3569_v3  ;;  %v926_v42 = vpop.f32.mrb[21].mxu0  ;;  %1294 = vst [vmem:[#allocation13 + $0x88] sm:$0xff] %v1198_v36  ;;  %v1323_v43 = vpack.c.bf16 %v1198_v36, %v1197_v31  ;;  %2614 = vmatprep.subr.bf16.mxu1 %v2725_v33 }
 0x359   :  { %v2896_v44 = vpop.eup %2895  ;;  %2901 = vpow2.f32 %v1115_v37  ;;  %v927_v45 = vadd.f32 %v926_v42, %v3573_v4  ;;  %v928_v46 = vpop.f32.mrb[22].mxu0 }
 0x35a   :  { %1245 = vst [vmem:[#allocation13 + $0xf0] sm:$0xff] %v3628_v41  ;;  %v3633_v47 = vadd.f32 %v928_v46, %v3569_v3  ;;  %v930_v48 = vpop.f32.mrb[23].mxu0  ;;  %2582 = vmatprep.mubr.bf16.mxu1 %v1323_v43  ;;  %v1167_v49 = vmul.f32 %v2896_v44, %v1039_v40 }
 0x35b   :  { %v2898_v50 = vpop.eup %2897  ;;  %v1075_v51 = vmul.f32 0.5, %v927_v45  ;;  %1246 = vst [vmem:[#allocation13 + $0xf8] sm:$0xff] %v927_v45  ;;  %v931_v52 = vadd.f32 %v930_v48, %v3573_v4  ;;  %2615 = vmatpush3.bf16.msra.mxu1 %v2725_v33  ;;  %v1045_v48 = vld [vmem:[#allocation5 + $0x60] sm:$0xff] }
 0x35c   :  { %1247 = vst [vmem:[#allocation13 + $0x108] sm:$0xff] %v3633_v47  ;;  %v1168_v54 = vmul.f32 %v2898_v50, %v1040_v38  ;;  %v1199_v55 = vadd.f32 %v1167_v49, %v3603_v53  ;;  %2616 = vmatprep.subr.bf16.mxu1 %v2726_v32  ;;  %v2728_v53 = vld [vmem:[#allocation10 + $0x68] sm:$0xff]  }
 0x35d   :  { %v1117_v57 = vmul.f32 1.442695, %v1075_v51  ;;  %v1076_v2 = vmul.f32 0.5, %v931_v52  ;;  %1248 = vst [vmem:[#allocation13 + $0x110] sm:$0xff] %v931_v52 }
 0x35e   :  { %v1200_v7 = vadd.f32 %v1168_v54, %v3608_v59  ;;  %1295 = vst [vmem:[#allocation13 + $0xa0] sm:$0xff] %v1199_v55  ;;  %v1042_v59 = vld [vmem:[#allocation5 + $0x48] sm:$0xff] }
 0x35f   :  { %2903 = vpow2.f32 %v1117_v57  ;;  %v1119_v58 = vmul.f32 1.442695, %v1076_v2  ;;  %v934_v60 = vpop.f32.mrb[24].mxu0  ;;  %2617 = vmatpush3.bf16.msra.mxu1 %v2726_v32 }
 0x360   :  { %v3640_v5 = vadd.f32 %v934_v60, %v3569_v3  ;;  %v936_v6 = vpop.f32.mrb[25].mxu0  ;;  %1296 = vst [vmem:[#allocation13 + $0xb8] sm:$0xff] %v1200_v7  ;;  %v1324_v8 = vpack.c.bf16 %v1200_v7, %v1199_v55  ;;  %2618 = vmatprep.subr.bf16.mxu1 %v2727_v56  ;;  %v1046_v55 = vld [vmem:[#allocation5 + $0x68] sm:$0xff] }
 0x361   :  { %v2900_v9 = vpop.eup %2899  ;;  %2905 = vpow2.f32 %v1119_v58  ;;  %v937_v10 = vadd.f32 %v936_v6, %v3573_v4  ;;  %v938_v11 = vpop.f32.mrb[26].mxu0 }
 0x362   :  { %1249 = vst [vmem:[#allocation13 + $0x120] sm:$0xff] %v3640_v5  ;;  %v3645_v12 = vadd.f32 %v938_v11, %v3569_v3  ;;  %v940_v13 = vpop.f32.mrb[27].mxu0  ;;  %2583 = vmatmul.mubr.bf16.gmra.mrb[68].mxu1 %v1324_v8  ;;  %v1169_v14 = vmul.f32 %v2900_v9, %v1041_v63  ;;  %v1047_v11 = vld [vmem:[#allocation5 + $0x70] sm:$0xff] }
 0x363   :  { %v2902_v15 = vpop.eup %2901  ;;  %v1077_v17 = vmul.f32 0.5, %v937_v10  ;;  %1250 = vst [vmem:[#allocation13 + $0x128] sm:$0xff] %v937_v10  ;;  %v941_v18 = vadd.f32 %v940_v13, %v3573_v4  ;;  %2619 = vmatpush3.bf16.msra.mxu1 %v2727_v56 }
 0x364   :  { %1251 = vst [vmem:[#allocation13 + $0x138] sm:$0xff] %v3645_v12  ;;  %v1170_v20 = vmul.f32 %v2902_v15, %v1042_v59  ;;  %v1201_v21 = vadd.f32 %v1169_v14, %v3615_v16  ;;  %2620 = vmatprep.subr.bf16.mxu1 %v2728_v53 }
 0x365   :  { %v1121_v19 = vmul.f32 1.442695, %v1077_v17  ;;  %v1078_v22 = vmul.f32 0.5, %v941_v18  ;;  %1252 = vst [vmem:[#allocation13 + $0x140] sm:$0xff] %v941_v18  ;;  %v1048_v18 = vld [vmem:[#allocation5 + $0x78] sm:$0xff] }
 0x366   :  { %v1202_v24 = vadd.f32 %v1170_v20, %v3620_v23  ;;  %1297 = vst [vmem:[#allocation13 + $0xd0] sm:$0xff] %v1201_v21 }
 0x367   :  { %2907 = vpow2.f32 %v1121_v19  ;;  %v1123_v25 = vmul.f32 1.442695, %v1078_v22  ;;  %v944_v26 = vpop.f32.mrb[28].mxu0  ;;  %2621 = vmatpush3.bf16.msra.mxu1 %v2728_v53 }
 0x368   :  { %v3652_v28 = vadd.f32 %v944_v26, %v3569_v3  ;;  %v946_v29 = vpop.f32.mrb[29].mxu0  ;;  %1298 = vst [vmem:[#allocation13 + $0xe8] sm:$0xff] %v1202_v24  ;;  %v1325_v30 = vpack.c.bf16 %v1202_v24, %v1201_v21 }
 0x369   :  { %v2904_v31 = vpop.eup %2903  ;;  %2909 = vpow2.f32 %v1123_v25  ;;  %v947_v16 = vadd.f32 %v946_v29, %v3573_v4  ;;  %v948_v33 = vpop.f32.mrb[30].mxu0 }
 0x36a   :  { %1253 = vst [vmem:[#allocation13 + $0x150] sm:$0xff] %v3652_v28  ;;  %v3657_v23 = vadd.f32 %v948_v33, %v3569_v3  ;;  %v950_v35 = vpop.f32.mrb[31].mxu0  ;;  %2586 = vmatprep.mubr.bf16.mxu1 %v1325_v30  ;;  %v1171_v36 = vmul.f32 %v2904_v31, %v1043_v27  ;;  %v1049_v33 = vld [vmem:[#allocation5 + $0x80] sm:$0xff] }
 0x36b   :  { %v2906_v37 = vpop.eup %2905  ;;  %v1079_v39 = vmul.f32 0.5, %v947_v16  ;;  %1254 = vst [vmem:[#allocation13 + $0x158] sm:$0xff] %v947_v16  ;;  %v951_v40 = vadd.f32 %v950_v35, %v3573_v4 }
 0x36c   :  { %1255 = vst [vmem:[#allocation13 + $0x168] sm:$0xff] %v3657_v23  ;;  %v1172_v42 = vmul.f32 %v2906_v37, %v1044_v34  ;;  %v1203_v43 = vadd.f32 %v1171_v36, %v3628_v41 }
 0x36d   :  { %v1125_v32 = vmul.f32 1.442695, %v1079_v39  ;;  %v1080_v44 = vmul.f32 0.5, %v951_v40  ;;  %1256 = vst [vmem:[#allocation13 + $0x170] sm:$0xff] %v951_v40  ;;  %v1050_v40 = vld [vmem:[#allocation5 + $0x88] sm:$0xff] }
 0x36e   :  { %v1204_v45 = vadd.f32 %v1172_v42, %v3633_v47  ;;  %1299 = vst [vmem:[#allocation13 + $0x100] sm:$0xff] %v1203_v43 }
 0x36f   :  { %2911 = vpow2.f32 %v1125_v32  ;;  %v1127_v46 = vmul.f32 1.442695, %v1080_v44  ;;  %v954_v38 = vpop.f32.mrb[32].mxu0 }
 0x370   :  { %v3664_v49 = vadd.f32 %v954_v38, %v3569_v3  ;;  %v956_v50 = vpop.f32.mrb[33].mxu0  ;;  %1300 = vst [vmem:[#allocation13 + $0x118] sm:$0xff] %v1204_v45  ;;  %v1326_v51 = vpack.c.bf16 %v1204_v45, %v1203_v43 }
 0x371   :  { %v2908_v52 = vpop.eup %2907  ;;  %2913 = vpow2.f32 %v1127_v46  ;;  %v957_v41 = vadd.f32 %v956_v50, %v3573_v4  ;;  %v958_v54 = vpop.f32.mrb[34].mxu0 }
 0x372   :  { %1257 = vst [vmem:[#allocation13 + $0x180] sm:$0xff] %v3664_v49  ;;  %v3669_v47 = vadd.f32 %v958_v54, %v3569_v3  ;;  %v960_v56 = vpop.f32.mrb[35].mxu0  ;;  %2587 = vmatmul.mubr.bf16.gmra.mrb[72].mxu1 %v1326_v51  ;;  %v1173_v57 = vmul.f32 %v2908_v52, %v1045_v48  ;;  %v1051_v54 = vld [vmem:[#allocation5 + $0x90] sm:$0xff] }
 0x373   :  { %v2910_v2 = vpop.eup %2909  ;;  %v1081_v7 = vmul.f32 0.5, %v957_v41  ;;  %1258 = vst [vmem:[#allocation13 + $0x188] sm:$0xff] %v957_v41  ;;  %v961_v58 = vadd.f32 %v960_v56, %v3573_v4 }
 0x374   :  { %1259 = vst [vmem:[#allocation13 + $0x198] sm:$0xff] %v3669_v47  ;;  %v1174_v60 = vmul.f32 %v2910_v2, %v1046_v55  ;;  %v1205_v63 = vadd.f32 %v1173_v57, %v3640_v5 }
 0x375   :  { %v1129_v6 = vmul.f32 1.442695, %v1081_v7  ;;  %v1082_v8 = vmul.f32 0.5, %v961_v58  ;;  %1260 = vst [vmem:[#allocation13 + $0x1a0] sm:$0xff] %v961_v58  ;;  %v1052_v58 = vld [vmem:[#allocation5 + $0x98] sm:$0xff] }
 0x376   :  { %v1206_v53 = vadd.f32 %v1174_v60, %v3645_v12  ;;  %1301 = vst [vmem:[#allocation13 + $0x130] sm:$0xff] %v1205_v63 }
 0x377   :  { %2915 = vpow2.f32 %v1129_v6  ;;  %v1131_v9 = vmul.f32 1.442695, %v1082_v8  ;;  %v964_v10 = vpop.f32.mrb[36].mxu0 }
 0x378   :  { %v3676_v59 = vadd.f32 %v964_v10, %v3569_v3  ;;  %v966_v13 = vpop.f32.mrb[37].mxu0  ;;  %1302 = vst [vmem:[#allocation13 + $0x148] sm:$0xff] %v1206_v53  ;;  %v1327_v14 = vpack.c.bf16 %v1206_v53, %v1205_v63 }
 0x379   :  { %v2912_v15 = vpop.eup %2911  ;;  %2917 = vpow2.f32 %v1131_v9  ;;  %v967_v5 = vadd.f32 %v966_v13, %v3573_v4  ;;  %v968_v17 = vpop.f32.mrb[38].mxu0 }
 0x37a   :  { %1261 = vst [vmem:[#allocation13 + $0x1b0] sm:$0xff] %v3676_v59  ;;  %v3681_v12 = vadd.f32 %v968_v17, %v3569_v3  ;;  %v970_v20 = vpop.f32.mrb[39].mxu0  ;;  %2590 = vmatprep.mubr.bf16.mxu1 %v1327_v14  ;;  %v1175_v21 = vmul.f32 %v2912_v15, %v1047_v11  ;;  %v1053_v17 = vld [vmem:[#allocation5 + $0xa0] sm:$0xff] }
 0x37b   :  { %v2914_v19 = vpop.eup %2913  ;;  %v1083_v22 = vmul.f32 0.5, %v967_v5  ;;  %1262 = vst [vmem:[#allocation13 + $0x1b8] sm:$0xff] %v967_v5  ;;  %v971_v24 = vadd.f32 %v970_v20, %v3573_v4 }
 0x37c   :  { %1263 = vst [vmem:[#allocation13 + $0x1c8] sm:$0xff] %v3681_v12  ;;  %v1176_v25 = vmul.f32 %v2914_v19, %v1048_v18  ;;  %v1207_v26 = vadd.f32 %v1175_v21, %v3652_v28 }
 0x37d   :  { %v1133_v27 = vmul.f32 1.442695, %v1083_v22  ;;  %v1084_v29 = vmul.f32 0.5, %v971_v24  ;;  %1264 = vst [vmem:[#allocation13 + $0x1d0] sm:$0xff] %v971_v24  ;;  %v1054_v24 = vld [vmem:[#allocation5 + $0xa8] sm:$0xff] }
 0x37e   :  { %v1208_v30 = vadd.f32 %v1176_v25, %v3657_v23  ;;  %1303 = vst [vmem:[#allocation13 + $0x160] sm:$0xff] %v1207_v26 }
 0x37f   :  { %2919 = vpow2.f32 %v1133_v27  ;;  %v1135_v31 = vmul.f32 1.442695, %v1084_v29  ;;  %v974_v16 = vpop.f32.mrb[40].mxu0 }
 0x380   :  { %v3688_v34 = vadd.f32 %v974_v16, %v3569_v3  ;;  %v976_v35 = vpop.f32.mrb[41].mxu0  ;;  %1304 = vst [vmem:[#allocation13 + $0x178] sm:$0xff] %v1208_v30  ;;  %v1328_v36 = vpack.c.bf16 %v1208_v30, %v1207_v26 }
 0x381   :  { %v2916_v37 = vpop.eup %2915  ;;  %2921 = vpow2.f32 %v1135_v31  ;;  %v977_v28 = vadd.f32 %v976_v35, %v3573_v4  ;;  %v978_v39 = vpop.f32.mrb[42].mxu0 }
 0x382   :  { %1265 = vst [vmem:[#allocation13 + $0x1e0] sm:$0xff] %v3688_v34  ;;  %v3693_v23 = vadd.f32 %v978_v39, %v3569_v3  ;;  %v980_v42 = vpop.f32.mrb[43].mxu0  ;;  %2591 = vmatmul.mubr.bf16.gmra.mrb[76].mxu1 %v1328_v36  ;;  %v1177_v43 = vmul.f32 %v2916_v37, %v1049_v33  ;;  %v1055_v39 = vld [vmem:[#allocation5 + $0xb0] sm:$0xff] }
 0x383   :  { %v2918_v32 = vpop.eup %2917  ;;  %v1085_v44 = vmul.f32 0.5, %v977_v28  ;;  %1266 = vst [vmem:[#allocation13 + $0x1e8] sm:$0xff] %v977_v28  ;;  %v981_v45 = vadd.f32 %v980_v42, %v3573_v4 }
 0x384   :  { %1267 = vst [vmem:[#allocation13 + $0x1f8] sm:$0xff] %v3693_v23  ;;  %v1178_v46 = vmul.f32 %v2918_v32, %v1050_v40  ;;  %v1209_v38 = vadd.f32 %v1177_v43, %v3664_v49 }
 0x385   :  { %v1137_v48 = vmul.f32 1.442695, %v1085_v44  ;;  %v1086_v50 = vmul.f32 0.5, %v981_v45  ;;  %1268 = vst [vmem:[#allocation13 + $0x200] sm:$0xff] %v981_v45  ;;  %v1056_v45 = vld [vmem:[#allocation5 + $0xb8] sm:$0xff] }
 0x386   :  { %v1210_v51 = vadd.f32 %v1178_v46, %v3669_v47  ;;  %1305 = vst [vmem:[#allocation13 + $0x190] sm:$0xff] %v1209_v38 }
 0x387   :  { %2923 = vpow2.f32 %v1137_v48  ;;  %v1139_v52 = vmul.f32 1.442695, %v1086_v50  ;;  %v984_v41 = vpop.f32.mrb[44].mxu0 }
 0x388   :  { %v3700_v55 = vadd.f32 %v984_v41, %v3569_v3  ;;  %v986_v56 = vpop.f32.mrb[45].mxu0  ;;  %1306 = vst [vmem:[#allocation13 + $0x1a8] sm:$0xff] %v1210_v51  ;;  %v1329_v57 = vpack.c.bf16 %v1210_v51, %v1209_v38 }
 0x389   :  { %v2920_v2 = vpop.eup %2919  ;;  %2925 = vpow2.f32 %v1139_v52  ;;  %v987_v49 = vadd.f32 %v986_v56, %v3573_v4  ;;  %v988_v7 = vpop.f32.mrb[46].mxu0 }
 0x38a   :  { %1269 = vst [vmem:[#allocation13 + $0x210] sm:$0xff] %v3700_v55  ;;  %v3705_v47 = vadd.f32 %v988_v7, %v3569_v3  ;;  %v990_v60 = vpop.f32.mrb[47].mxu0  ;;  %2594 = vmatprep.mubr.bf16.mxu1 %v1329_v57  ;;  %v1179_v63 = vmul.f32 %v2920_v2, %v1051_v54  ;;  %v1057_v7 = vld [vmem:[#allocation5 + $0xc0] sm:$0xff] }
 0x38b   :  { %v2922_v6 = vpop.eup %2921  ;;  %v1087_v8 = vmul.f32 0.5, %v987_v49  ;;  %1270 = vst [vmem:[#allocation13 + $0x218] sm:$0xff] %v987_v49  ;;  %v991_v53 = vadd.f32 %v990_v60, %v3573_v4 }
 0x38c   :  { %1271 = vst [vmem:[#allocation13 + $0x228] sm:$0xff] %v3705_v47  ;;  %v1180_v9 = vmul.f32 %v2922_v6, %v1052_v58  ;;  %v1211_v10 = vadd.f32 %v1179_v63, %v3676_v59 }
 0x38d   :  { %v1141_v11 = vmul.f32 1.442695, %v1087_v8  ;;  %v1088_v13 = vmul.f32 0.5, %v991_v53  ;;  %1272 = vst [vmem:[#allocation13 + $0x230] sm:$0xff] %v991_v53  ;;  %v1058_v53 = vld [vmem:[#allocation5 + $0xc8] sm:$0xff] }
 0x38e   :  { %v1212_v14 = vadd.f32 %v1180_v9, %v3681_v12  ;;  %1307 = vst [vmem:[#allocation13 + $0x1c0] sm:$0xff] %v1211_v10 }
 0x38f   :  { %2927 = vpow2.f32 %v1141_v11  ;;  %v1143_v15 = vmul.f32 1.442695, %v1088_v13  ;;  %v994_v5 = vpop.f32.mrb[48].mxu0 }
 0x390   :  { %v3712_v18 = vadd.f32 %v994_v5, %v3569_v3  ;;  %v996_v20 = vpop.f32.mrb[49].mxu0  ;;  %1308 = vst [vmem:[#allocation13 + $0x1d8] sm:$0xff] %v1212_v14  ;;  %v1330_v21 = vpack.c.bf16 %v1212_v14, %v1211_v10 }
 0x391   :  { %v2924_v19 = vpop.eup %2923  ;;  %2929 = vpow2.f32 %v1143_v15  ;;  %v997_v59 = vadd.f32 %v996_v20, %v3573_v4  ;;  %v998_v22 = vpop.f32.mrb[50].mxu0 }
 0x392   :  { %1273 = vst [vmem:[#allocation13 + $0x240] sm:$0xff] %v3712_v18  ;;  %v3717_v12 = vadd.f32 %v998_v22, %v3569_v3  ;;  %v1000_v25 = vpop.f32.mrb[51].mxu0  ;;  %2595 = vmatmul.mubr.bf16.gmra.mrb[80].mxu1 %v1330_v21  ;;  %v1181_v26 = vmul.f32 %v2924_v19, %v1053_v17  ;;  %v1059_v22 = vld [vmem:[#allocation5 + $0xd0] sm:$0xff] }
 0x393   :  { %v2926_v27 = vpop.eup %2925  ;;  %v1089_v29 = vmul.f32 0.5, %v997_v59  ;;  %1274 = vst [vmem:[#allocation13 + $0x248] sm:$0xff] %v997_v59  ;;  %v1001_v30 = vadd.f32 %v1000_v25, %v3573_v4 }
 0x394   :  { %1275 = vst [vmem:[#allocation13 + $0x258] sm:$0xff] %v3717_v12  ;;  %v1182_v31 = vmul.f32 %v2926_v27, %v1054_v24  ;;  %v1213_v16 = vadd.f32 %v1181_v26, %v3688_v34 }
 0x395   :  { %v1145_v33 = vmul.f32 1.442695, %v1089_v29  ;;  %v1090_v35 = vmul.f32 0.5, %v1001_v30  ;;  %1276 = vst [vmem:[#allocation13 + $0x260] sm:$0xff] %v1001_v30  ;;  %v1060_v30 = vld [vmem:[#allocation5 + $0xd8] sm:$0xff] }
 0x396   :  { %v1214_v36 = vadd.f32 %v1182_v31, %v3693_v23  ;;  %1309 = vst [vmem:[#allocation13 + $0x1f0] sm:$0xff] %v1213_v16 }
 0x397   :  { %2931 = vpow2.f32 %v1145_v33  ;;  %v1147_v37 = vmul.f32 1.442695, %v1090_v35  ;;  %v1004_v28 = vpop.f32.mrb[52].mxu0 }
 0x398   :  { %v3724_v40 = vadd.f32 %v1004_v28, %v3569_v3  ;;  %v1006_v42 = vpop.f32.mrb[53].mxu0  ;;  %1310 = vst [vmem:[#allocation13 + $0x208] sm:$0xff] %v1214_v36  ;;  %v1331_v43 = vpack.c.bf16 %v1214_v36, %v1213_v16  ;;  %v2730_v28 = vld [vmem:[#allocation10 + $0x78] sm:$0xff]  }
 0x399   :  { %v2928_v32 = vpop.eup %2927  ;;  %2933 = vpow2.f32 %v1147_v37  ;;  %v1007_v34 = vadd.f32 %v1006_v42, %v3573_v4  ;;  %v1008_v44 = vpop.f32.mrb[54].mxu0  ;;  %v2729_v37 = vld [vmem:[#allocation10 + $0x70] sm:$0xff]  }
 0x39a   :  { %1277 = vst [vmem:[#allocation13 + $0x270] sm:$0xff] %v3724_v40  ;;  %v3729_v23 = vadd.f32 %v1008_v44, %v3569_v3  ;;  %v1010_v46 = vpop.f32.mrb[55].mxu0  ;;  %2598 = vmatprep.mubr.bf16.mxu1 %v1331_v43  ;;  %v1183_v38 = vmul.f32 %v2928_v32, %v1055_v39  ;;  %2622 = vmatprep.subr.bf16.mxu1 %v2729_v37  ;;  %v1061_v44 = vld [vmem:[#allocation5 + $0xe0] sm:$0xff] }
 0x39b   :  { %v2930_v48 = vpop.eup %2929  ;;  %v1091_v50 = vmul.f32 0.5, %v1007_v34  ;;  %1278 = vst [vmem:[#allocation13 + $0x278] sm:$0xff] %v1007_v34  ;;  %v1011_v51 = vadd.f32 %v1010_v46, %v3573_v4  ;;  %2623 = vmatpush3.bf16.msra.mxu1 %v2729_v37  ;;  %v1062_v46 = vld [vmem:[#allocation5 + $0xe8] sm:$0xff]  ;;  %v2746_v37 = vld [vmem:[#allocation11 + $0x50] ss:$8 sps:$4 sm:$0xff]  }
 0x39c   :  { %1279 = vst [vmem:[#allocation13 + $0x288] sm:$0xff] %v3729_v23  ;;  %v1184_v52 = vmul.f32 %v2930_v48, %v1056_v45  ;;  %v1215_v41 = vadd.f32 %v1183_v38, %v3700_v55  ;;  %2624 = vmatprep.subr.bf16.mxu1 %v2730_v28 }
 0x39d   :  { %v1149_v54 = vmul.f32 1.442695, %v1091_v50  ;;  %v1092_v56 = vmul.f32 0.5, %v1011_v51  ;;  %1280 = vst [vmem:[#allocation13 + $0x290] sm:$0xff] %v1011_v51  ;;  %v1063_v51 = vld [vmem:[#allocation5 + $0xf0] sm:$0xff] }
 0x39e   :  { %v1216_v57 = vadd.f32 %v1184_v52, %v3705_v47  ;;  %1311 = vst [vmem:[#allocation13 + $0x220] sm:$0xff] %v1215_v41 }
 0x39f   :  { %2935 = vpow2.f32 %v1149_v54  ;;  %v1151_v2 = vmul.f32 1.442695, %v1092_v56  ;;  %v1014_v49 = vpop.f32.mrb[56].mxu0  ;;  %2625 = vmatpush3.bf16.msra.mxu1 %v2730_v28  ;;  %v1064_v54 = vld [vmem:[#allocation5 + $0xf8] sm:$0xff] }
 0x3a0   :  { %v3736_v58 = vadd.f32 %v1014_v49, %v3569_v3  ;;  %v1016_v60 = vpop.f32.mrb[57].mxu0  ;;  %1312 = vst [vmem:[#allocation13 + $0x238] sm:$0xff] %v1216_v57  ;;  %v1332_v63 = vpack.c.bf16 %v1216_v57, %v1215_v41 }
 0x3a1   :  { %v2932_v6 = vpop.eup %2931  ;;  %2937 = vpow2.f32 %v1151_v2  ;;  %v1017_v55 = vadd.f32 %v1016_v60, %v3573_v4  ;;  %v1018_v8 = vpop.f32.mrb[58].mxu0 }
 0x3a2   :  { %1281 = vst [vmem:[#allocation13 + $0x2a0] sm:$0xff] %v3736_v58  ;;  %v3741_v47 = vadd.f32 %v1018_v8, %v3569_v3  ;;  %v1020_v9 = vpop.f32.mrb[59].mxu0  ;;  %2599 = vmatmul.mubr.bf16.gmra.mrb[84].mxu1 %v1332_v63  ;;  %v1185_v10 = vmul.f32 %v2932_v6, %v1057_v7  ;;  %v2731_v63 = vld [vmem:[#allocation11] ss:$8 sps:$4 sm:$0xff]  }
 0x3a3   :  { %v2934_v11 = vpop.eup %2933  ;;  %v1093_v13 = vmul.f32 0.5, %v1017_v55  ;;  %1282 = vst [vmem:[#allocation13 + $0x2a8] sm:$0xff] %v1017_v55  ;;  %v1021_v14 = vadd.f32 %v1020_v9, %v3573_v4  ;;  %v3758_v6 = vld [vmem:[%s3950_s7] ss:$0 sm:$0xff] }
 0x3a4   :  { %1283 = vst [vmem:[#allocation13 + $0x2b8] sm:$0xff] %v3741_v47  ;;  %v1186_v15 = vmul.f32 %v2934_v11, %v1058_v53  ;;  %v1217_v5 = vadd.f32 %v1185_v10, %v3712_v18 }
 0x3a5   :  { %v1153_v17 = vmul.f32 1.442695, %v1093_v13  ;;  %v1094_v20 = vmul.f32 0.5, %v1021_v14  ;;  %1284 = vst [vmem:[#allocation13 + $0x2c0] sm:$0xff] %v1021_v14  ;;  %v2734_v14 = vld [vmem:[#allocation11 + $0x10] ss:$8 sps:$4 sm:$0xff]  }
 0x3a6   :  { %v1218_v21 = vadd.f32 %v1186_v15, %v3717_v12  ;;  %1313 = vst [vmem:[#allocation13 + $0x250] sm:$0xff] %v1217_v5  ;;  %v2736_v15 = vld [vmem:[#allocation11 + $0x14] ss:$8 sps:$4 sm:$0xff]  }
 0x3a7   :  { %2939 = vpow2.f32 %v1153_v17  ;;  %v1155_v19 = vmul.f32 1.442695, %v1094_v20  ;;  %v1024_v59 = vpop.f32.mrb[60].mxu0  ;;  %v2737_v17 = vld [vmem:[#allocation11 + $0x20] ss:$8 sps:$4 sm:$0xff]  }
 0x3a8   :  { %v1025_v24 = vadd.f32 %v1024_v59, %v3569_v3  ;;  %v1026_v25 = vpop.f32.mrb[61].mxu0  ;;  %1314 = vst [vmem:[#allocation13 + $0x268] sm:$0xff] %v1218_v21  ;;  %v1333_v26 = vpack.c.bf16 %v1218_v21, %v1217_v5  ;;  %v2739_v5 = vld [vmem:[#allocation11 + $0x24] ss:$8 sps:$4 sm:$0xff]   ;;  %v2742_v20 = vld [vmem:[#allocation11 + $0x34] ss:$8 sps:$4 sm:$0xff]  }
 0x3a9   :  { %v2936_v27 = vpop.eup %2935  ;;  %2941 = vpow2.f32 %v1155_v19  ;;  %v1027_v29 = vadd.f32 %v1026_v25, %v3573_v4  ;;  %v1028_v18 = vpop.f32.mrb[62].mxu0  ;;  %v2740_v21 = vld [vmem:[#allocation11 + $0x30] ss:$8 sps:$4 sm:$0xff]   ;;  %v2745_v19 = vld [vmem:[#allocation11 + $0x44] ss:$8 sps:$4 sm:$0xff]  }
 0x3aa   :  { %1285 = vst [vmem:[#allocation13 + $0x2d0] sm:$0xff] %v1025_v24  ;;  %v1029_v31 = vadd.f32 %v1028_v18, %v3569_v3  ;;  %v1030_v12 = vpop.f32.mrb[63].mxu0  ;;  %2602 = vmatprep.mubr.bf16.mxu1 %v1333_v26  ;;  %v1187_v16 = vmul.f32 %v2936_v27, %v1059_v22  ;;  %v2743_v25 = vld [vmem:[#allocation11 + $0x40] ss:$8 sps:$4 sm:$0xff]   ;;  %v2748_v18 = vld [vmem:[#allocation11 + $0x54] ss:$8 sps:$4 sm:$0xff]  }
 0x3ab   :  { %v2938_v33 = vpop.eup %2937  ;;  %v1095_v35 = vmul.f32 0.5, %v1027_v29  ;;  %1286 = vst [vmem:[#allocation13 + $0x2d8] sm:$0xff] %v1027_v29  ;;  %v1031_v36 = vadd.f32 %v1030_v12, %v3573_v4 }
 0x3ac   :  { %1287 = vst [vmem:[#allocation13 + $0x2e8] sm:$0xff] %v1029_v31  ;;  %v1188_v39 = vmul.f32 %v2938_v33, %v1060_v30  ;;  %v1219_v42 = vadd.f32 %v1187_v16, %v3724_v40 }
 0x3ad   :  { %v1157_v43 = vmul.f32 1.442695, %v1095_v35  ;;  %v1096_v32 = vmul.f32 0.5, %v1031_v36  ;;  %1288 = vst [vmem:[#allocation13 + $0x2f0] sm:$0xff] %v1031_v36 }
 0x3ae   :  { %v1220_v3 = vadd.f32 %v1188_v39, %v3729_v23  ;;  %1315 = vst [vmem:[#allocation13 + $0x280] sm:$0xff] %v1219_v42  ;;  %v2751_v39 = vld [vmem:[#allocation11 + $0x64] ss:$8 sps:$4 sm:$0xff]  }
 0x3af   :  { %2943 = vpow2.f32 %v1157_v43  ;;  %v1159_v34 = vmul.f32 1.442695, %v1096_v32 }
 0x3b0   :  { %1316 = vst [vmem:[#allocation13 + $0x298] sm:$0xff] %v1220_v3  ;;  %v1334_v4 = vpack.c.bf16 %v1220_v3, %v1219_v42  ;;  %v2749_v42 = vld [vmem:[#allocation11 + $0x60] ss:$8 sps:$4 sm:$0xff]  }
 0x3b1   :  { %v2940_v45 = vpop.eup %2939  ;;  %2945 = vpow2.f32 %v1159_v34 }
 0x3b2   :  { %2603 = vmatmul.mubr.bf16.gmra.mrb[88].mxu1 %v1334_v4  ;;  %v1189_v38 = vmul.f32 %v2940_v45, %v1061_v44 }
 0x3b3   :  { %v2942_v40 = vpop.eup %2941 }
 0x3b4   :  { %v1190_v48 = vmul.f32 %v2942_v40, %v1062_v46  ;;  %v1221_v50 = vadd.f32 %v1189_v38, %v3736_v58  ;;  %v2733_v58 = vld [vmem:[#allocation11 + $0x4] ss:$8 sps:$4 sm:$0xff]  }
 0x3b5   :  { %2007 = vmatprep.subr.bf16.mxu0 %v2733_v58 }
 0x3b6   :  { %v1222_v23 = vadd.f32 %v1190_v48, %v3741_v47  ;;  %1317 = vst [vmem:[#allocation13 + $0x2b0] sm:$0xff] %v1221_v50  ;;  %2008 = vmatpush1.bf16.msra.mxu0 %v2731_v63 }
 0x3b7   :  { %2009 = vmatprep.subr.bf16.mxu0 %v2736_v15 }
 0x3b8   :  { %1318 = vst [vmem:[#allocation13 + $0x2c8] sm:$0xff] %v1222_v23  ;;  %v1335_v52 = vpack.c.bf16 %v1222_v23, %v1221_v50 }
 0x3b9   :  { %v2944_v41 = vpop.eup %2943 }
 0x3ba   :  { %2606 = vmatprep.mubr.bf16.mxu1 %v1335_v52  ;;  %v1191_v56 = vmul.f32 %v2944_v41, %v1063_v51  ;;  %2010 = vmatpush1.bf16.msra.mxu0 %v2734_v14 }
 0x3bb   :  { %v2946_v57 = vpop.eup %2945  ;;  %2011 = vmatprep.subr.bf16.mxu0 %v2739_v5 }
 0x3bc   :  { %v1192_v2 = vmul.f32 %v2946_v57, %v1064_v54  ;;  %v1223_v49 = vadd.f32 %v1191_v56, %v1025_v24 }
 0x3be   :  { %v1224_v7 = vadd.f32 %v1192_v2, %v1029_v31  ;;  %1319 = vst [vmem:[#allocation13 + $0x2e0] sm:$0xff] %v1223_v49  ;;  %2012 = vmatpush1.bf16.msra.mxu0 %v2737_v17 }
 0x3bf   :  { %2013 = vmatprep.subr.bf16.mxu0 %v2742_v20 }
 0x3c0   :  { %1320 = vst [vmem:[#allocation13 + $0x2f8] sm:$0xff] %v1224_v7  ;;  %v1336_v60 = vpack.c.bf16 %v1224_v7, %v1223_v49 }
 0x3c2   :  { %2607 = vmatmul.mubr.bf16.gmra.mrb[92].mxu1 %v1336_v60  ;;  %2014 = vmatpush1.bf16.msra.mxu0 %v2740_v21 }
 0x3c3   :  { %2015 = vmatprep.subr.bf16.mxu0 %v2745_v19 }
 0x3c6   :  { %2016 = vmatpush1.bf16.msra.mxu0 %v2743_v25 }
 0x3c7   :  { %2017 = vmatprep.subr.bf16.mxu0 %v2748_v18 }
 0x3ca   :  { %2018 = vmatpush1.bf16.msra.mxu0 %v2746_v37 }
 0x3cb   :  { %2019 = vmatprep.subr.bf16.mxu0 %v2751_v39 }
 0x3ce   :  { %2020 = vmatpush1.bf16.msra.mxu0 %v2749_v42 }
 0x425   :  { %v2580_v55 = vpop.f32.mrb[64].mxu1 }
 0x426   :  { %v1451_v8 = vadd.f32 %v2580_v55, %v3758_v6  ;;  %v1442_v53 = vpop.f32.mrb[65].mxu1 }
 0x427   :  { %v1443_v47 = vadd.f32 %v3758_v6, %v1442_v53  ;;  %v2581_v9 = vpop.f32.mrb[66].mxu1 }
 0x428   :  { %2947 = vtanh.f32 %v1451_v8  ;;  %v1454_v10 = vadd.f32 %v2581_v9, %v3758_v6  ;;  %v1445_v11 = vpop.f32.mrb[67].mxu1 }
 0x429   :  { %2949 = vtanh.f32 %v1443_v47  ;;  %v1446_v13 = vadd.f32 %v3758_v6, %v1445_v11 }
 0x42a   :  { %2951 = vtanh.f32 %v1454_v10 }
 0x42b   :  { %2953 = vtanh.f32 %v1446_v13 }
 0x432   :  { %v2948_v59 = vpop.eup %2947 }
 0x433   :  { %v2950_v22 = vpop.eup %2949 }
 0x434   :  { %v2952_v24 = vpop.eup %2951 }
 0x435   :  { %v2954_v26 = vpop.eup %2953  ;;  %v2584_v27 = vpop.f32.mrb[68].mxu1  ;;  %v1602_v29 = vpack.c.bf16 %v2952_v24, %v2948_v59 }
 0x436   :  { %v1467_v30 = vadd.f32 %v2584_v27, %v3758_v6  ;;  %v1458_v31 = vpop.f32.mrb[69].mxu1  ;;  %v1601_v12 = vpack.c.bf16 %v2954_v26, %v2950_v22 }
 0x437   :  { %v1459_v16 = vadd.f32 %v3758_v6, %v1458_v31  ;;  %v2585_v33 = vpop.f32.mrb[70].mxu1 }
 0x438   :  { %2955 = vtanh.f32 %v1467_v30  ;;  %v1470_v35 = vadd.f32 %v2585_v33, %v3758_v6  ;;  %v1461_v36 = vpop.f32.mrb[71].mxu1  ;;  %2626 = vmatprep.mubr.bf16.mxu1 %v1601_v12 }
 0x439   :  { %2957 = vtanh.f32 %v1459_v16  ;;  %v1462_v28 = vadd.f32 %v3758_v6, %v1461_v36  ;;  %2627 = vmatmul.mubr.bf16.vlgmr.msra.gmra.mrb[96].mxu1 %v1602_v29 }
 0x43a   :  { %2959 = vtanh.f32 %v1470_v35 }
 0x43b   :  { %2961 = vtanh.f32 %v1462_v28 }
 0x442   :  { %v2956_v43 = vpop.eup %2955 }
 0x443   :  { %v2958_v32 = vpop.eup %2957 }
 0x444   :  { %v2960_v3 = vpop.eup %2959 }
 0x445   :  { %v2962_v34 = vpop.eup %2961  ;;  %v2588_v44 = vpop.f32.mrb[72].mxu1  ;;  %v1604_v4 = vpack.c.bf16 %v2960_v3, %v2956_v43 }
 0x446   :  { %v1483_v45 = vadd.f32 %v2588_v44, %v3758_v6  ;;  %v1474_v46 = vpop.f32.mrb[73].mxu1  ;;  %v1603_v38 = vpack.c.bf16 %v2962_v34, %v2958_v32 }
 0x447   :  { %v1475_v40 = vadd.f32 %v3758_v6, %v1474_v46  ;;  %v2589_v48 = vpop.f32.mrb[74].mxu1 }
 0x448   :  { %2963 = vtanh.f32 %v1483_v45  ;;  %v1486_v50 = vadd.f32 %v2589_v48, %v3758_v6  ;;  %v1477_v23 = vpop.f32.mrb[75].mxu1  ;;  %2630 = vmatprep.mubr.bf16.mxu1 %v1603_v38 }
 0x449   :  { %2965 = vtanh.f32 %v1475_v40  ;;  %v1478_v51 = vadd.f32 %v3758_v6, %v1477_v23  ;;  %2631 = vmatmul.mubr.bf16.gmra.mrb[100].mxu1 %v1604_v4  ;;  %v2754_v23 = vld [vmem:[#allocation11 + $0x74] ss:$8 sps:$4 sm:$0xff]  }
 0x44a   :  { %2967 = vtanh.f32 %v1486_v50  ;;  %v2752_v50 = vld [vmem:[#allocation11 + $0x70] ss:$8 sps:$4 sm:$0xff]   ;;  %2021 = vmatprep.subr.bf16.mxu0 %v2754_v23 }
 0x44b   :  { %2969 = vtanh.f32 %v1478_v51  ;;  %2022 = vmatpush1.bf16.msra.mxu0 %v2752_v50 }
 0x452   :  { %v2964_v52 = vpop.eup %2963 }
 0x453   :  { %v2966_v41 = vpop.eup %2965 }
 0x454   :  { %v2968_v54 = vpop.eup %2967 }
 0x455   :  { %v2970_v56 = vpop.eup %2969  ;;  %v2592_v57 = vpop.f32.mrb[76].mxu1  ;;  %v1606_v2 = vpack.c.bf16 %v2968_v54, %v2964_v52 }
 0x456   :  { %v1499_v49 = vadd.f32 %v2592_v57, %v3758_v6  ;;  %v1490_v7 = vpop.f32.mrb[77].mxu1  ;;  %v1605_v60 = vpack.c.bf16 %v2970_v56, %v2966_v41 }
 0x457   :  { %v1491_v63 = vadd.f32 %v3758_v6, %v1490_v7  ;;  %v2593_v58 = vpop.f32.mrb[78].mxu1 }
 0x458   :  { %2971 = vtanh.f32 %v1499_v49  ;;  %v1502_v55 = vadd.f32 %v2593_v58, %v3758_v6  ;;  %v1493_v8 = vpop.f32.mrb[79].mxu1  ;;  %2634 = vmatprep.mubr.bf16.mxu1 %v1605_v60 }
 0x459   :  { %2973 = vtanh.f32 %v1491_v63  ;;  %v1494_v53 = vadd.f32 %v3758_v6, %v1493_v8  ;;  %2635 = vmatmul.mubr.bf16.gmra.mrb[104].mxu1 %v1606_v2 }
 0x45a   :  { %2975 = vtanh.f32 %v1502_v55 }
 0x45b   :  { %2977 = vtanh.f32 %v1494_v53 }
 0x462   :  { %v2972_v47 = vpop.eup %2971 }
 0x463   :  { %v2974_v9 = vpop.eup %2973 }
 0x464   :  { %v2976_v10 = vpop.eup %2975 }
 0x465   :  { %v2978_v11 = vpop.eup %2977  ;;  %v2596_v13 = vpop.f32.mrb[80].mxu1  ;;  %v1608_v14 = vpack.c.bf16 %v2976_v10, %v2972_v47 }
 0x466   :  { %v1515_v15 = vadd.f32 %v2596_v13, %v3758_v6  ;;  %v1506_v5 = vpop.f32.mrb[81].mxu1  ;;  %v1607_v17 = vpack.c.bf16 %v2978_v11, %v2974_v9 }
 0x467   :  { %v1507_v20 = vadd.f32 %v3758_v6, %v1506_v5  ;;  %v2597_v21 = vpop.f32.mrb[82].mxu1 }
 0x468   :  { %2979 = vtanh.f32 %v1515_v15  ;;  %v1518_v19 = vadd.f32 %v2597_v21, %v3758_v6  ;;  %v1509_v59 = vpop.f32.mrb[83].mxu1  ;;  %2638 = vmatprep.mubr.bf16.mxu1 %v1607_v17 }
 0x469   :  { %2981 = vtanh.f32 %v1507_v20  ;;  %v1510_v22 = vadd.f32 %v3758_v6, %v1509_v59  ;;  %2639 = vmatmul.mubr.bf16.gmra.mrb[108].mxu1 %v1608_v14  ;;  %v3795_v14 = vld [vmem:[%s3950_s7 + $0x1] ss:$0 sm:$0xff] }
 0x46a   :  { %2983 = vtanh.f32 %v1518_v19 }
 0x46b   :  { %2985 = vtanh.f32 %v1510_v22 }
 0x472   :  { %v2980_v24 = vpop.eup %2979 }
 0x473   :  { %v2982_v25 = vpop.eup %2981 }
 0x474   :  { %v2984_v26 = vpop.eup %2983 }
 0x475   :  { %v2986_v27 = vpop.eup %2985  ;;  %v2600_v29 = vpop.f32.mrb[84].mxu1  ;;  %v1610_v18 = vpack.c.bf16 %v2984_v26, %v2980_v24 }
 0x476   :  { %v1531_v30 = vadd.f32 %v2600_v29, %v3758_v6  ;;  %v1522_v31 = vpop.f32.mrb[85].mxu1  ;;  %v1609_v12 = vpack.c.bf16 %v2986_v27, %v2982_v25 }
 0x477   :  { %v1523_v16 = vadd.f32 %v3758_v6, %v1522_v31  ;;  %v2601_v33 = vpop.f32.mrb[86].mxu1 }
 0x478   :  { %2987 = vtanh.f32 %v1531_v30  ;;  %v1534_v35 = vadd.f32 %v2601_v33, %v3758_v6  ;;  %v1525_v36 = vpop.f32.mrb[87].mxu1  ;;  %2642 = vmatprep.mubr.bf16.mxu1 %v1609_v12 }
 0x479   :  { %2989 = vtanh.f32 %v1523_v16  ;;  %v1526_v37 = vadd.f32 %v3758_v6, %v1525_v36  ;;  %2643 = vmatmul.mubr.bf16.gmra.mrb[112].mxu1 %v1610_v18 }
 0x47a   :  { %2991 = vtanh.f32 %v1534_v35 }
 0x47b   :  { %2993 = vtanh.f32 %v1526_v37 }
 0x482   :  { %v2988_v28 = vpop.eup %2987 }
 0x483   :  { %v2990_v39 = vpop.eup %2989 }
 0x484   :  { %v2992_v42 = vpop.eup %2991 }
 0x485   :  { %v2994_v43 = vpop.eup %2993  ;;  %v2604_v32 = vpop.f32.mrb[88].mxu1  ;;  %v1612_v3 = vpack.c.bf16 %v2992_v42, %v2988_v28 }
 0x486   :  { %v1547_v34 = vadd.f32 %v2604_v32, %v3758_v6  ;;  %v1538_v44 = vpop.f32.mrb[89].mxu1  ;;  %v1611_v4 = vpack.c.bf16 %v2994_v43, %v2990_v39 }
 0x487   :  { %v1539_v45 = vadd.f32 %v3758_v6, %v1538_v44  ;;  %v2605_v46 = vpop.f32.mrb[90].mxu1 }
 0x488   :  { %2995 = vtanh.f32 %v1547_v34  ;;  %v1550_v38 = vadd.f32 %v2605_v46, %v3758_v6  ;;  %v1541_v40 = vpop.f32.mrb[91].mxu1  ;;  %2646 = vmatprep.mubr.bf16.mxu1 %v1611_v4 }
 0x489   :  { %2997 = vtanh.f32 %v1539_v45  ;;  %v1542_v48 = vadd.f32 %v3758_v6, %v1541_v40  ;;  %2647 = vmatmul.mubr.bf16.gmra.mrb[116].mxu1 %v1612_v3 }
 0x48a   :  { %2999 = vtanh.f32 %v1550_v38 }
 0x48b   :  { %3001 = vtanh.f32 %v1542_v48 }
 0x492   :  { %v2996_v51 = vpop.eup %2995 }
 0x493   :  { %v2998_v52 = vpop.eup %2997 }
 0x494   :  { %v3000_v41 = vpop.eup %2999 }
 0x495   :  { %v3002_v54 = vpop.eup %3001  ;;  %v2608_v56 = vpop.f32.mrb[92].mxu1  ;;  %v1614_v57 = vpack.c.bf16 %v3000_v41, %v2996_v51 }
 0x496   :  { %v1563_v2 = vadd.f32 %v2608_v56, %v3758_v6  ;;  %v1554_v49 = vpop.f32.mrb[93].mxu1  ;;  %v1613_v7 = vpack.c.bf16 %v3002_v54, %v2998_v52 }
 0x497   :  { %v1555_v60 = vadd.f32 %v3758_v6, %v1554_v49  ;;  %v2609_v63 = vpop.f32.mrb[94].mxu1 }
 0x498   :  { %3003 = vtanh.f32 %v1563_v2  ;;  %v1566_v58 = vadd.f32 %v2609_v63, %v3758_v6  ;;  %v1557_v55 = vpop.f32.mrb[95].mxu1  ;;  %2650 = vmatprep.mubr.bf16.mxu1 %v1613_v7 }
 0x499   :  { %3005 = vtanh.f32 %v1555_v60  ;;  %v1558_v8 = vadd.f32 %v3758_v6, %v1557_v55  ;;  %2651 = vmatmul.mubr.bf16.gmra.mrb[120].mxu1 %v1614_v57 }
 0x49a   :  { %3007 = vtanh.f32 %v1566_v58 }
 0x49b   :  { %3009 = vtanh.f32 %v1558_v8 }
 0x4a2   :  { %v3004_v53 = vpop.eup %3003 }
 0x4a3   :  { %v3006_v47 = vpop.eup %3005 }
 0x4a4   :  { %v3008_v9 = vpop.eup %3007 }
 0x4a5   :  { %v3010_v10 = vpop.eup %3009  ;;  %v1616_v11 = vpack.c.bf16 %v3008_v9, %v3004_v53 }
 0x4a6   :  { %v1615_v13 = vpack.c.bf16 %v3010_v10, %v3006_v47 }
 0x4a8   :  { %2654 = vmatprep.mubr.bf16.mxu1 %v1615_v13 }
 0x4a9   :  { %2655 = vmatmul.mubr.bf16.gmra.mrb[124].mxu1 %v1616_v11 }
 0x50c   :  { %v2628_v15 = vpop.f32.mrb[96].mxu1 }
 0x50d   :  { %v1733_v5 = vadd.f32 %v2628_v15, %v3795_v14  ;;  %v1724_v6 = vpop.f32.mrb[97].mxu1 }
 0x50e   :  { %v1725_v17 = vadd.f32 %v3795_v14, %v1724_v6  ;;  %v2629_v20 = vpop.f32.mrb[98].mxu1 }
 0x50f   :  { %3011 = vtanh.f32 %v1733_v5  ;;  %v1736_v21 = vadd.f32 %v2629_v20, %v3795_v14  ;;  %v1727_v19 = vpop.f32.mrb[99].mxu1 }
 0x510   :  { %3013 = vtanh.f32 %v1725_v17  ;;  %v1728_v59 = vadd.f32 %v3795_v14, %v1727_v19 }
 0x511   :  { %3015 = vtanh.f32 %v1736_v21 }
 0x512   :  { %3017 = vtanh.f32 %v1728_v59 }
 0x519   :  { %v3012_v22 = vpop.eup %3011 }
 0x51a   :  { %v3014_v24 = vpop.eup %3013 }
 0x51b   :  { %v3016_v25 = vpop.eup %3015 }
 0x51c   :  { %v3018_v26 = vpop.eup %3017  ;;  %v2632_v27 = vpop.f32.mrb[100].mxu1  ;;  %v1884_v29 = vpack.c.bf16 %v3016_v25, %v3012_v22 }
 0x51d   :  { %v1749_v18 = vadd.f32 %v2632_v27, %v3795_v14  ;;  %v1740_v30 = vpop.f32.mrb[101].mxu1  ;;  %v1883_v31 = vpack.c.bf16 %v3018_v26, %v3014_v24 }
 0x51e   :  { %v1741_v12 = vadd.f32 %v3795_v14, %v1740_v30  ;;  %v2633_v16 = vpop.f32.mrb[102].mxu1 }
 0x51f   :  { %3019 = vtanh.f32 %v1749_v18  ;;  %v1752_v33 = vadd.f32 %v2633_v16, %v3795_v14  ;;  %v1743_v35 = vpop.f32.mrb[103].mxu1  ;;  %2040 = vmatmul.mubr.bf16.vlgmr.msra.gmra.mrb[64].mxu0 %v1883_v31 }
 0x520   :  { %3021 = vtanh.f32 %v1741_v12  ;;  %v1744_v36 = vadd.f32 %v3795_v14, %v1743_v35  ;;  %2049 = vmatprep.mubr.bf16.mxu0 %v3273_v1 }
 0x521   :  { %3023 = vtanh.f32 %v1752_v33 }
 0x522   :  { %3025 = vtanh.f32 %v1744_v36 }
 0x527   :  { %2050 = vmatmul.mubr.bf16.gmra.mrb[68].mxu0 %v1884_v29 }
 0x528   :  { %2059 = vmatprep.mubr.bf16.mxu0 %v3273_v1 }
 0x529   :  { %v3020_v37 = vpop.eup %3019 }
 0x52a   :  { %v3022_v28 = vpop.eup %3021 }
 0x52b   :  { %v3024_v39 = vpop.eup %3023 }
 0x52c   :  { %v3026_v42 = vpop.eup %3025  ;;  %v2636_v43 = vpop.f32.mrb[104].mxu1  ;;  %v1886_v32 = vpack.c.bf16 %v3024_v39, %v3020_v37 }
 0x52d   :  { %v1765_v3 = vadd.f32 %v2636_v43, %v3795_v14  ;;  %v1756_v34 = vpop.f32.mrb[105].mxu1  ;;  %v1885_v44 = vpack.c.bf16 %v3026_v42, %v3022_v28 }
 0x52e   :  { %v1757_v4 = vadd.f32 %v3795_v14, %v1756_v34  ;;  %v2637_v45 = vpop.f32.mrb[106].mxu1 }
 0x52f   :  { %3027 = vtanh.f32 %v1765_v3  ;;  %v1768_v46 = vadd.f32 %v2637_v45, %v3795_v14  ;;  %v1759_v38 = vpop.f32.mrb[107].mxu1  ;;  %2060 = vmatmul.mubr.bf16.gmra.mrb[72].mxu0 %v1885_v44 }
 0x530   :  { %3029 = vtanh.f32 %v1757_v4  ;;  %v1760_v40 = vadd.f32 %v3795_v14, %v1759_v38  ;;  %2069 = vmatprep.mubr.bf16.mxu0 %v3273_v1 }
 0x531   :  { %3031 = vtanh.f32 %v1768_v46 }
 0x532   :  { %3033 = vtanh.f32 %v1760_v40 }
 0x537   :  { %2070 = vmatmul.mubr.bf16.gmra.mrb[76].mxu0 %v1886_v32 }
 0x538   :  { %2079 = vmatprep.mubr.bf16.mxu0 %v3273_v1 }
 0x539   :  { %v3028_v48 = vpop.eup %3027 }
 0x53a   :  { %v3030_v50 = vpop.eup %3029 }
 0x53b   :  { %v3032_v23 = vpop.eup %3031 }
 0x53c   :  { %v3034_v51 = vpop.eup %3033  ;;  %v2640_v52 = vpop.f32.mrb[108].mxu1  ;;  %v1888_v41 = vpack.c.bf16 %v3032_v23, %v3028_v48 }
 0x53d   :  { %v1781_v54 = vadd.f32 %v2640_v52, %v3795_v14  ;;  %v1772_v56 = vpop.f32.mrb[109].mxu1  ;;  %v1887_v57 = vpack.c.bf16 %v3034_v51, %v3030_v50 }
 0x53e   :  { %v1773_v2 = vadd.f32 %v3795_v14, %v1772_v56  ;;  %v2641_v49 = vpop.f32.mrb[110].mxu1 }
 0x53f   :  { %3035 = vtanh.f32 %v1781_v54  ;;  %v1784_v7 = vadd.f32 %v2641_v49, %v3795_v14  ;;  %v1775_v60 = vpop.f32.mrb[111].mxu1  ;;  %2080 = vmatmul.mubr.bf16.gmra.mrb[80].mxu0 %v1887_v57 }
 0x540   :  { %3037 = vtanh.f32 %v1773_v2  ;;  %v1776_v63 = vadd.f32 %v3795_v14, %v1775_v60  ;;  %2089 = vmatprep.mubr.bf16.mxu0 %v3273_v1 }
 0x541   :  { %3039 = vtanh.f32 %v1784_v7 }
 0x542   :  { %3041 = vtanh.f32 %v1776_v63 }
 0x547   :  { %2090 = vmatmul.mubr.bf16.gmra.mrb[84].mxu0 %v1888_v41 }
 0x548   :  { %2099 = vmatprep.mubr.bf16.mxu0 %v3273_v1 }
 0x549   :  { %v3036_v58 = vpop.eup %3035 }
 0x54a   :  { %v3038_v55 = vpop.eup %3037 }
 0x54b   :  { %v3040_v8 = vpop.eup %3039 }
 0x54c   :  { %v3042_v53 = vpop.eup %3041  ;;  %v2644_v47 = vpop.f32.mrb[112].mxu1  ;;  %v1890_v9 = vpack.c.bf16 %v3040_v8, %v3036_v58 }
 0x54d   :  { %v1797_v10 = vadd.f32 %v2644_v47, %v3795_v14  ;;  %v1788_v11 = vpop.f32.mrb[113].mxu1  ;;  %v1889_v13 = vpack.c.bf16 %v3042_v53, %v3038_v55 }
 0x54e   :  { %v1789_v15 = vadd.f32 %v3795_v14, %v1788_v11  ;;  %v2645_v5 = vpop.f32.mrb[114].mxu1 }
 0x54f   :  { %3043 = vtanh.f32 %v1797_v10  ;;  %v1800_v6 = vadd.f32 %v2645_v5, %v3795_v14  ;;  %v1791_v17 = vpop.f32.mrb[115].mxu1  ;;  %2100 = vmatmul.mubr.bf16.gmra.mrb[88].mxu0 %v1889_v13 }
 0x550   :  { %3045 = vtanh.f32 %v1789_v15  ;;  %v1792_v20 = vadd.f32 %v3795_v14, %v1791_v17  ;;  %2109 = vmatprep.mubr.bf16.mxu0 %v3273_v1 }
 0x551   :  { %3047 = vtanh.f32 %v1800_v6 }
 0x552   :  { %3049 = vtanh.f32 %v1792_v20 }
 0x557   :  { %2110 = vmatmul.mubr.bf16.gmra.mrb[92].mxu0 %v1890_v9 }
 0x558   :  { %2119 = vmatprep.mubr.bf16.mxu0 %v3273_v1 }
 0x559   :  { %v3044_v21 = vpop.eup %3043 }
 0x55a   :  { %v3046_v19 = vpop.eup %3045 }
 0x55b   :  { %v3048_v59 = vpop.eup %3047 }
 0x55c   :  { %v3050_v22 = vpop.eup %3049  ;;  %v2648_v24 = vpop.f32.mrb[116].mxu1  ;;  %v1892_v25 = vpack.c.bf16 %v3048_v59, %v3044_v21 }
 0x55d   :  { %v1813_v26 = vadd.f32 %v2648_v24, %v3795_v14  ;;  %v1804_v27 = vpop.f32.mrb[117].mxu1  ;;  %v1891_v29 = vpack.c.bf16 %v3050_v22, %v3046_v19 }
 0x55e   :  { %v1805_v18 = vadd.f32 %v3795_v14, %v1804_v27  ;;  %v2649_v30 = vpop.f32.mrb[118].mxu1 }
 0x55f   :  { %3051 = vtanh.f32 %v1813_v26  ;;  %v1816_v31 = vadd.f32 %v2649_v30, %v3795_v14  ;;  %v1807_v12 = vpop.f32.mrb[119].mxu1  ;;  %2120 = vmatmul.mubr.bf16.gmra.mrb[96].mxu0 %v1891_v29 }
 0x560   :  { %3053 = vtanh.f32 %v1805_v18  ;;  %v1808_v16 = vadd.f32 %v3795_v14, %v1807_v12  ;;  %2129 = vmatprep.mubr.bf16.mxu0 %v3273_v1 }
 0x561   :  { %3055 = vtanh.f32 %v1816_v31 }
 0x562   :  { %3057 = vtanh.f32 %v1808_v16 }
 0x567   :  { %2130 = vmatmul.mubr.bf16.gmra.mrb[100].mxu0 %v1892_v25 }
 0x568   :  { %2139 = vmatprep.mubr.bf16.mxu0 %v3273_v1 }
 0x569   :  { %v3052_v33 = vpop.eup %3051 }
 0x56a   :  { %v3054_v35 = vpop.eup %3053 }
 0x56b   :  { %v3056_v36 = vpop.eup %3055 }
 0x56c   :  { %v3058_v37 = vpop.eup %3057  ;;  %v2652_v28 = vpop.f32.mrb[120].mxu1  ;;  %v1894_v39 = vpack.c.bf16 %v3056_v36, %v3052_v33 }
 0x56d   :  { %v1829_v42 = vadd.f32 %v2652_v28, %v3795_v14  ;;  %v1820_v43 = vpop.f32.mrb[121].mxu1  ;;  %v1893_v32 = vpack.c.bf16 %v3058_v37, %v3054_v35 }
 0x56e   :  { %v1821_v3 = vadd.f32 %v3795_v14, %v1820_v43  ;;  %v2653_v34 = vpop.f32.mrb[122].mxu1 }
 0x56f   :  { %3059 = vtanh.f32 %v1829_v42  ;;  %v1832_v44 = vadd.f32 %v2653_v34, %v3795_v14  ;;  %v1823_v4 = vpop.f32.mrb[123].mxu1  ;;  %2140 = vmatmul.mubr.bf16.gmra.mrb[104].mxu0 %v1893_v32 }
 0x570   :  { %3061 = vtanh.f32 %v1821_v3  ;;  %v1824_v45 = vadd.f32 %v3795_v14, %v1823_v4  ;;  %2149 = vmatprep.mubr.bf16.mxu0 %v3273_v1 }
 0x571   :  { %3063 = vtanh.f32 %v1832_v44 }
 0x572   :  { %3065 = vtanh.f32 %v1824_v45 }
 0x577   :  { %2150 = vmatmul.mubr.bf16.gmra.mrb[108].mxu0 %v1894_v39 }
 0x578   :  { %2159 = vmatprep.mubr.bf16.mxu0 %v3273_v1 }
 0x579   :  { %v3060_v46 = vpop.eup %3059 }
 0x57a   :  { %v3062_v38 = vpop.eup %3061 }
 0x57b   :  { %v3064_v40 = vpop.eup %3063 }
 0x57c   :  { %v3066_v48 = vpop.eup %3065  ;;  %v2656_v50 = vpop.f32.mrb[124].mxu1  ;;  %v1896_v23 = vpack.c.bf16 %v3064_v40, %v3060_v46 }
 0x57d   :  { %v1845_v51 = vadd.f32 %v2656_v50, %v3795_v14  ;;  %v1836_v52 = vpop.f32.mrb[125].mxu1  ;;  %v1895_v41 = vpack.c.bf16 %v3066_v48, %v3062_v38 }
 0x57e   :  { %v1837_v54 = vadd.f32 %v3795_v14, %v1836_v52  ;;  %v2657_v56 = vpop.f32.mrb[126].mxu1 }
 0x57f   :  { %3067 = vtanh.f32 %v1845_v51  ;;  %v1848_v57 = vadd.f32 %v2657_v56, %v3795_v14  ;;  %v1839_v2 = vpop.f32.mrb[127].mxu1  ;;  %2160 = vmatmul.mubr.bf16.gmra.mrb[112].mxu0 %v1895_v41 }
 0x580   :  { %3069 = vtanh.f32 %v1837_v54  ;;  %v1840_v49 = vadd.f32 %v3795_v14, %v1839_v2  ;;  %2169 = vmatprep.mubr.bf16.mxu0 %v3273_v1  ;;  %v1915_v14 = vld [vmem:[%s3952_s9] sm:$0x3] }
 0x581   :  { %3071 = vtanh.f32 %v1848_v57  ;;  %v3849_v53 = vrot.slane %v1915_v14, %v752_v62  ;;  %v3853_v47 = vrot.slane %v1915_v14, %v756_v0 }
 0x582   :  { %3073 = vtanh.f32 %v1840_v49 }
 0x587   :  { %2170 = vmatmul.mubr.bf16.gmra.mrb[116].mxu0 %v1896_v23 }
 0x588   :  { %2179 = vmatprep.mubr.bf16.mxu0 %v3273_v1 }
 0x589   :  { %v3068_v7 = vpop.eup %3067 }
 0x58a   :  { %v3070_v60 = vpop.eup %3069 }
 0x58b   :  { %v3072_v63 = vpop.eup %3071 }
 0x58c   :  { %v3074_v58 = vpop.eup %3073  ;;  %v1898_v55 = vpack.c.bf16 %v3072_v63, %v3068_v7 }
 0x58d   :  { %v1897_v8 = vpack.c.bf16 %v3074_v58, %v3070_v60 }
 0x58f   :  { %2180 = vmatmul.mubr.bf16.gmra.mrb[120].mxu0 %v1897_v8 }
 0x590   :  { %2189 = vmatprep.mubr.bf16.mxu0 %v3273_v1 }
 0x597   :  { %2190 = vmatmul.mubr.bf16.gmra.mrb[124].mxu0 %v1898_v55 }
 0x5f2   :  { %v2041_v9 = vpop.f32.mrb[64].mxu0 }
 0x5f3   :  { %3218 = shalt.err (!%p3215_p10)
}
 0x5f4   :  { %s3219_s27 = scalar_lea.hbm %s3953_s10, 12288 }
 0x5f5   :  { %p3220_p11 = scmp.ne.s32.totalorder %s3953_s10, %s3219_s27  ;;  %p3223_p12 = scmp.lt.u32.totalorder %s3219_s27, %s3953_s10 }
 0x5f7   :  { %p3225_p13 = pnand %p3223_p12, %p3220_p11 }
 0x5f9   :  { %3228 = shalt.err (!%p3225_p13)
}
 0x5fa   :  { %s3275_s12 = smov 384   ;;  %s3276_s13 = smov 24   ;;  %v2042_v1 = vadd.f32 %v2041_v9, %v3849_v53  ;;  %v2043_v61 = vpop.f32.mrb[65].mxu0 }
 0x5fb   :  { %2275 = dma.vmem_to_hbm [thread:$0]  %s2270_s23, 12288, %s3953_s10, [#allocation4], %s3275_s12, %s3275_s12, %s3276_s13   ;;  %v2044_v62 = vadd.f32 %v2043_v61, %v3853_v47  ;;  %v2045_v0 = vpop.f32.mrb[66].mxu0 }
 0x5fc   :  { %2200 = vst [vmem:[#allocation14] sm:$0xff] %v2042_v1  ;;  %v2046_v10 = vadd.f32 %v2045_v0, %v3849_v53  ;;  %v2047_v11 = vpop.f32.mrb[67].mxu0  ;;  %s3277_s10 = smov [#allocation14]  }
 0x5fd   :  { %2201 = vst [vmem:[#allocation14 + $0x8] sm:$0xff] %v2044_v62  ;;  %v2048_v13 = vadd.f32 %v2047_v11, %v3853_v47  ;;  %v2051_v15 = vpop.f32.mrb[68].mxu0  ;;  %s2281_s4 = sshll.u32 %s3277_s10, 4  ;;  %s2282_s4 = int_to_ptr.vmem [resolvable:$true] %s2281_s4 }
 0x5fe   :  { %2202 = vst [vmem:[#allocation14 + $0x10] sm:$0xff] %v2046_v10  ;;  %v2052_v5 = vadd.f32 %v2051_v15, %v3849_v53  ;;  %v2053_v6 = vpop.f32.mrb[69].mxu0  ;;  %s3229_s6 = scalar_lea.vmem %s2282_s4, 8192  ;;  %p3234_p1 = scmp.lt.s32.totalorder %s2282_s4, %s2282_s4 }
 0x5ff   :  { %2203 = vst [vmem:[#allocation14 + $0x18] sm:$0xff] %v2048_v13  ;;  %v2054_v17 = vadd.f32 %v2053_v6, %v3853_v47  ;;  %v2055_v20 = vpop.f32.mrb[70].mxu0  ;;  %p3230_p0 = scmp.ne.s32.totalorder %s2282_s4, %s3229_s6  ;;  %p3235_p2 = scmp.lt.s32.totalorder %s3229_s6, %s3229_s6 }
 0x600   :  { %2204 = vst [vmem:[#allocation14 + $0x20] sm:$0xff] %v2052_v5  ;;  %v2056_v21 = vadd.f32 %v2055_v20, %v3849_v53  ;;  %v2057_v19 = vpop.f32.mrb[71].mxu0 }
 0x601   :  { %2205 = vst [vmem:[#allocation14 + $0x28] sm:$0xff] %v2054_v17  ;;  %v2058_v59 = vadd.f32 %v2057_v19, %v3853_v47  ;;  %p3236_p3 = por %p3235_p2, %p3234_p1 }
 0x602   :  { %2206 = vst [vmem:[#allocation14 + $0x30] sm:$0xff] %v2056_v21  ;;  %v2061_v22 = vpop.f32.mrb[72].mxu0 }
 0x603   :  { %2207 = vst [vmem:[#allocation14 + $0x38] sm:$0xff] %v2058_v59  ;;  %v2062_v24 = vadd.f32 %v2061_v22, %v3849_v53  ;;  %v2063_v25 = vpop.f32.mrb[73].mxu0  ;;  %p3237_p4 = pnand %p3236_p3, %p3230_p0 }
 0x604   :  { %v2064_v26 = vadd.f32 %v2063_v25, %v3853_v47  ;;  %v2065_v27 = vpop.f32.mrb[74].mxu0 }
 0x605   :  { %2208 = vst [vmem:[#allocation14 + $0x40] sm:$0xff] %v2062_v24  ;;  %v2066_v29 = vadd.f32 %v2065_v27, %v3849_v53  ;;  %v2067_v18 = vpop.f32.mrb[75].mxu0 }
 0x606   :  { %2209 = vst [vmem:[#allocation14 + $0x48] sm:$0xff] %v2064_v26  ;;  %v2068_v30 = vadd.f32 %v2067_v18, %v3853_v47 }
 0x607   :  { %2210 = vst [vmem:[#allocation14 + $0x50] sm:$0xff] %v2066_v29 }
 0x608   :  { %2211 = vst [vmem:[#allocation14 + $0x58] sm:$0xff] %v2068_v30 }
 0x60a   :  { %v2071_v31 = vpop.f32.mrb[76].mxu0 }
 0x60b   :  { %v2072_v12 = vadd.f32 %v2071_v31, %v3849_v53  ;;  %v2073_v16 = vpop.f32.mrb[77].mxu0 }
 0x60c   :  { %v2074_v33 = vadd.f32 %v2073_v16, %v3853_v47  ;;  %v2075_v35 = vpop.f32.mrb[78].mxu0 }
 0x60d   :  { %2212 = vst [vmem:[#allocation14 + $0x60] sm:$0xff] %v2072_v12  ;;  %v2076_v36 = vadd.f32 %v2075_v35, %v3849_v53  ;;  %v2077_v37 = vpop.f32.mrb[79].mxu0 }
 0x60e   :  { %2213 = vst [vmem:[#allocation14 + $0x68] sm:$0xff] %v2074_v33  ;;  %v2078_v28 = vadd.f32 %v2077_v37, %v3853_v47 }
 0x60f   :  { %2214 = vst [vmem:[#allocation14 + $0x70] sm:$0xff] %v2076_v36 }
 0x610   :  { %2215 = vst [vmem:[#allocation14 + $0x78] sm:$0xff] %v2078_v28 }
 0x612   :  { %v2081_v39 = vpop.f32.mrb[80].mxu0 }
 0x613   :  { %v2082_v42 = vadd.f32 %v2081_v39, %v3849_v53  ;;  %v2083_v43 = vpop.f32.mrb[81].mxu0 }
 0x614   :  { %v2084_v32 = vadd.f32 %v2083_v43, %v3853_v47  ;;  %v2085_v3 = vpop.f32.mrb[82].mxu0 }
 0x615   :  { %2216 = vst [vmem:[#allocation14 + $0x80] sm:$0xff] %v2082_v42  ;;  %v2086_v34 = vadd.f32 %v2085_v3, %v3849_v53  ;;  %v2087_v44 = vpop.f32.mrb[83].mxu0 }
 0x616   :  { %2217 = vst [vmem:[#allocation14 + $0x88] sm:$0xff] %v2084_v32  ;;  %v2088_v4 = vadd.f32 %v2087_v44, %v3853_v47 }
 0x617   :  { %2218 = vst [vmem:[#allocation14 + $0x90] sm:$0xff] %v2086_v34 }
 0x618   :  { %2219 = vst [vmem:[#allocation14 + $0x98] sm:$0xff] %v2088_v4 }
 0x61a   :  { %v2091_v45 = vpop.f32.mrb[84].mxu0 }
 0x61b   :  { %v2092_v46 = vadd.f32 %v2091_v45, %v3849_v53  ;;  %v2093_v38 = vpop.f32.mrb[85].mxu0 }
 0x61c   :  { %v2094_v40 = vadd.f32 %v2093_v38, %v3853_v47  ;;  %v2095_v48 = vpop.f32.mrb[86].mxu0 }
 0x61d   :  { %2220 = vst [vmem:[#allocation14 + $0xa0] sm:$0xff] %v2092_v46  ;;  %v2096_v50 = vadd.f32 %v2095_v48, %v3849_v53  ;;  %v2097_v23 = vpop.f32.mrb[87].mxu0 }
 0x61e   :  { %2221 = vst [vmem:[#allocation14 + $0xa8] sm:$0xff] %v2094_v40  ;;  %v2098_v51 = vadd.f32 %v2097_v23, %v3853_v47 }
 0x61f   :  { %2222 = vst [vmem:[#allocation14 + $0xb0] sm:$0xff] %v2096_v50 }
 0x620   :  { %2223 = vst [vmem:[#allocation14 + $0xb8] sm:$0xff] %v2098_v51 }
 0x622   :  { %v2101_v52 = vpop.f32.mrb[88].mxu0 }
 0x623   :  { %v2102_v41 = vadd.f32 %v2101_v52, %v3849_v53  ;;  %v2103_v54 = vpop.f32.mrb[89].mxu0 }
 0x624   :  { %v2104_v56 = vadd.f32 %v2103_v54, %v3853_v47  ;;  %v2105_v57 = vpop.f32.mrb[90].mxu0 }
 0x625   :  { %2224 = vst [vmem:[#allocation14 + $0xc0] sm:$0xff] %v2102_v41  ;;  %v2106_v2 = vadd.f32 %v2105_v57, %v3849_v53  ;;  %v2107_v49 = vpop.f32.mrb[91].mxu0 }
 0x626   :  { %2225 = vst [vmem:[#allocation14 + $0xc8] sm:$0xff] %v2104_v56  ;;  %v2108_v7 = vadd.f32 %v2107_v49, %v3853_v47 }
 0x627   :  { %2226 = vst [vmem:[#allocation14 + $0xd0] sm:$0xff] %v2106_v2 }
 0x628   :  { %2227 = vst [vmem:[#allocation14 + $0xd8] sm:$0xff] %v2108_v7 }
 0x62a   :  { %v2111_v60 = vpop.f32.mrb[92].mxu0 }
 0x62b   :  { %v2112_v63 = vadd.f32 %v2111_v60, %v3849_v53  ;;  %v2113_v58 = vpop.f32.mrb[93].mxu0 }
 0x62c   :  { %v2114_v55 = vadd.f32 %v2113_v58, %v3853_v47  ;;  %v2115_v8 = vpop.f32.mrb[94].mxu0 }
 0x62d   :  { %2228 = vst [vmem:[#allocation14 + $0xe0] sm:$0xff] %v2112_v63  ;;  %v2116_v14 = vadd.f32 %v2115_v8, %v3849_v53  ;;  %v2117_v9 = vpop.f32.mrb[95].mxu0 }
 0x62e   :  { %2229 = vst [vmem:[#allocation14 + $0xe8] sm:$0xff] %v2114_v55  ;;  %v2118_v1 = vadd.f32 %v2117_v9, %v3853_v47 }
 0x62f   :  { %2230 = vst [vmem:[#allocation14 + $0xf0] sm:$0xff] %v2116_v14 }
 0x630   :  { %2231 = vst [vmem:[#allocation14 + $0xf8] sm:$0xff] %v2118_v1 }
 0x632   :  { %v2121_v61 = vpop.f32.mrb[96].mxu0 }
 0x633   :  { %v2122_v62 = vadd.f32 %v2121_v61, %v3849_v53  ;;  %v2123_v0 = vpop.f32.mrb[97].mxu0 }
 0x634   :  { %v2124_v10 = vadd.f32 %v2123_v0, %v3853_v47  ;;  %v2125_v11 = vpop.f32.mrb[98].mxu0 }
 0x635   :  { %2232 = vst [vmem:[#allocation14 + $0x100] sm:$0xff] %v2122_v62  ;;  %v2126_v13 = vadd.f32 %v2125_v11, %v3849_v53  ;;  %v2127_v15 = vpop.f32.mrb[99].mxu0 }
 0x636   :  { %2233 = vst [vmem:[#allocation14 + $0x108] sm:$0xff] %v2124_v10  ;;  %v2128_v5 = vadd.f32 %v2127_v15, %v3853_v47 }
 0x637   :  { %2234 = vst [vmem:[#allocation14 + $0x110] sm:$0xff] %v2126_v13 }
 0x638   :  { %2235 = vst [vmem:[#allocation14 + $0x118] sm:$0xff] %v2128_v5 }
 0x63a   :  { %v2131_v6 = vpop.f32.mrb[100].mxu0 }
 0x63b   :  { %v2132_v17 = vadd.f32 %v2131_v6, %v3849_v53  ;;  %v2133_v20 = vpop.f32.mrb[101].mxu0 }
 0x63c   :  { %v2134_v21 = vadd.f32 %v2133_v20, %v3853_v47  ;;  %v2135_v19 = vpop.f32.mrb[102].mxu0 }
 0x63d   :  { %2236 = vst [vmem:[#allocation14 + $0x120] sm:$0xff] %v2132_v17  ;;  %v2136_v59 = vadd.f32 %v2135_v19, %v3849_v53  ;;  %v2137_v22 = vpop.f32.mrb[103].mxu0 }
 0x63e   :  { %2237 = vst [vmem:[#allocation14 + $0x128] sm:$0xff] %v2134_v21  ;;  %v2138_v24 = vadd.f32 %v2137_v22, %v3853_v47 }
 0x63f   :  { %2238 = vst [vmem:[#allocation14 + $0x130] sm:$0xff] %v2136_v59 }
 0x640   :  { %2239 = vst [vmem:[#allocation14 + $0x138] sm:$0xff] %v2138_v24 }
 0x642   :  { %v2141_v25 = vpop.f32.mrb[104].mxu0 }
 0x643   :  { %v2142_v26 = vadd.f32 %v2141_v25, %v3849_v53  ;;  %v2143_v27 = vpop.f32.mrb[105].mxu0 }
 0x644   :  { %v2144_v29 = vadd.f32 %v2143_v27, %v3853_v47  ;;  %v2145_v18 = vpop.f32.mrb[106].mxu0 }
 0x645   :  { %2240 = vst [vmem:[#allocation14 + $0x140] sm:$0xff] %v2142_v26  ;;  %v2146_v30 = vadd.f32 %v2145_v18, %v3849_v53  ;;  %v2147_v31 = vpop.f32.mrb[107].mxu0 }
 0x646   :  { %2241 = vst [vmem:[#allocation14 + $0x148] sm:$0xff] %v2144_v29  ;;  %v2148_v12 = vadd.f32 %v2147_v31, %v3853_v47 }
 0x647   :  { %2242 = vst [vmem:[#allocation14 + $0x150] sm:$0xff] %v2146_v30 }
 0x648   :  { %2243 = vst [vmem:[#allocation14 + $0x158] sm:$0xff] %v2148_v12 }
 0x64a   :  { %v2151_v16 = vpop.f32.mrb[108].mxu0 }
 0x64b   :  { %v2152_v33 = vadd.f32 %v2151_v16, %v3849_v53  ;;  %v2153_v35 = vpop.f32.mrb[109].mxu0 }
 0x64c   :  { %v2154_v36 = vadd.f32 %v2153_v35, %v3853_v47  ;;  %v2155_v37 = vpop.f32.mrb[110].mxu0 }
 0x64d   :  { %2244 = vst [vmem:[#allocation14 + $0x160] sm:$0xff] %v2152_v33  ;;  %v2156_v28 = vadd.f32 %v2155_v37, %v3849_v53  ;;  %v2157_v39 = vpop.f32.mrb[111].mxu0 }
 0x64e   :  { %2245 = vst [vmem:[#allocation14 + $0x168] sm:$0xff] %v2154_v36  ;;  %v2158_v42 = vadd.f32 %v2157_v39, %v3853_v47 }
 0x64f   :  { %2246 = vst [vmem:[#allocation14 + $0x170] sm:$0xff] %v2156_v28 }
 0x650   :  { %2247 = vst [vmem:[#allocation14 + $0x178] sm:$0xff] %v2158_v42 }
 0x652   :  { %v2161_v43 = vpop.f32.mrb[112].mxu0 }
 0x653   :  { %v2162_v32 = vadd.f32 %v2161_v43, %v3849_v53  ;;  %v2163_v3 = vpop.f32.mrb[113].mxu0 }
 0x654   :  { %v2164_v34 = vadd.f32 %v2163_v3, %v3853_v47  ;;  %v2165_v44 = vpop.f32.mrb[114].mxu0 }
 0x655   :  { %2248 = vst [vmem:[#allocation14 + $0x180] sm:$0xff] %v2162_v32  ;;  %v2166_v4 = vadd.f32 %v2165_v44, %v3849_v53  ;;  %v2167_v45 = vpop.f32.mrb[115].mxu0 }
 0x656   :  { %2249 = vst [vmem:[#allocation14 + $0x188] sm:$0xff] %v2164_v34  ;;  %v2168_v46 = vadd.f32 %v2167_v45, %v3853_v47 }
 0x657   :  { %2250 = vst [vmem:[#allocation14 + $0x190] sm:$0xff] %v2166_v4 }
 0x658   :  { %2251 = vst [vmem:[#allocation14 + $0x198] sm:$0xff] %v2168_v46 }
 0x65a   :  { %v2171_v38 = vpop.f32.mrb[116].mxu0 }
 0x65b   :  { %v2172_v40 = vadd.f32 %v2171_v38, %v3849_v53  ;;  %v2173_v48 = vpop.f32.mrb[117].mxu0 }
 0x65c   :  { %v2174_v50 = vadd.f32 %v2173_v48, %v3853_v47  ;;  %v2175_v23 = vpop.f32.mrb[118].mxu0 }
 0x65d   :  { %2252 = vst [vmem:[#allocation14 + $0x1a0] sm:$0xff] %v2172_v40  ;;  %v2176_v51 = vadd.f32 %v2175_v23, %v3849_v53  ;;  %v2177_v52 = vpop.f32.mrb[119].mxu0 }
 0x65e   :  { %2253 = vst [vmem:[#allocation14 + $0x1a8] sm:$0xff] %v2174_v50  ;;  %v2178_v41 = vadd.f32 %v2177_v52, %v3853_v47 }
 0x65f   :  { %2254 = vst [vmem:[#allocation14 + $0x1b0] sm:$0xff] %v2176_v51 }
 0x660   :  { %2255 = vst [vmem:[#allocation14 + $0x1b8] sm:$0xff] %v2178_v41 }
 0x662   :  { %v2181_v54 = vpop.f32.mrb[120].mxu0 }
 0x663   :  { %v2182_v56 = vadd.f32 %v2181_v54, %v3849_v53  ;;  %v2183_v57 = vpop.f32.mrb[121].mxu0 }
 0x664   :  { %v2184_v2 = vadd.f32 %v2183_v57, %v3853_v47  ;;  %v2185_v49 = vpop.f32.mrb[122].mxu0 }
 0x665   :  { %2256 = vst [vmem:[#allocation14 + $0x1c0] sm:$0xff] %v2182_v56  ;;  %v2186_v7 = vadd.f32 %v2185_v49, %v3849_v53  ;;  %v2187_v60 = vpop.f32.mrb[123].mxu0 }
 0x666   :  { %2257 = vst [vmem:[#allocation14 + $0x1c8] sm:$0xff] %v2184_v2  ;;  %v2188_v63 = vadd.f32 %v2187_v60, %v3853_v47 }
 0x667   :  { %2258 = vst [vmem:[#allocation14 + $0x1d0] sm:$0xff] %v2186_v7 }
 0x668   :  { %2259 = vst [vmem:[#allocation14 + $0x1d8] sm:$0xff] %v2188_v63 }
 0x66a   :  { %v2191_v58 = vpop.f32.mrb[124].mxu0 }
 0x66b   :  { %v2192_v55 = vadd.f32 %v2191_v58, %v3849_v53  ;;  %v2193_v8 = vpop.f32.mrb[125].mxu0 }
 0x66c   :  { %v2194_v14 = vadd.f32 %v2193_v8, %v3853_v47  ;;  %v2195_v9 = vpop.f32.mrb[126].mxu0 }
 0x66d   :  { %2260 = vst [vmem:[#allocation14 + $0x1e0] sm:$0xff] %v2192_v55  ;;  %v2196_v1 = vadd.f32 %v2195_v9, %v3849_v53  ;;  %v2197_v61 = vpop.f32.mrb[127].mxu0 }
 0x66e   :  { %2261 = vst [vmem:[#allocation14 + $0x1e8] sm:$0xff] %v2194_v14  ;;  %v2198_v62 = vadd.f32 %v2197_v61, %v3853_v47 }
 0x66f   :  { %2262 = vst [vmem:[#allocation14 + $0x1f0] sm:$0xff] %v2196_v1 }
 0x670   :  { %2263 = vst [vmem:[#allocation14 + $0x1f8] sm:$0xff] %v2198_v62 }
 0x671   :  { %3240 = shalt.err (!%p3237_p4)
}
 0x672   :  { %s3241_s29 = scalar_lea.hbm %s3954_s11, 8192 }
 0x673   :  { %p3242_p5 = scmp.ne.s32.totalorder %s3954_s11, %s3241_s29  ;;  %p3245_p6 = scmp.lt.u32.totalorder %s3241_s29, %s3954_s11 }
 0x675   :  { %p3247_p7 = pnand %p3245_p6, %p3242_p5 }
 0x677   :  { %3250 = shalt.err (!%p3247_p7)
}
 0x678   :  { %s3278_s5 = smov 256   ;;  %s3279_s17 = smov 16  }
 0x679   :  { %2287 = dma.vmem_to_hbm [thread:$0]  %s2282_s4, 8192, %s3954_s11, [#allocation15], %s3278_s5, %s3278_s5, %s3279_s17  }
 0x67a   :  { %3259 = dma.done.wait [#allocation4], 12288  }
 0x67b   :  { %3260 = vsyncadd [#allocation4], 4294955008 }
 0x67c   :  { %3261 = dma.done.wait [#allocation15], 8192  }
 0x67d   :  { %3262 = vsyncadd [#allocation15], 4294959104 }
 0x67e   :  { %2294 = vsyncpa [#allocation3], 1 }
 0x67f   :  { %2295 = vsyncpa [#allocation6], 1 }
 0x680   :  { %2296 = vsyncpa [#allocation9], 1 }
 0x681   :  { %2297 = vsyncpa [#allocation12], 1 }
 0x682   :  { %2298 = vsyncpa [#allocation4], 1 }
 0x683   :  { %2299 = vsyncpa [#allocation15], 1 }

</bundles_post_ra>
